<compile_context>
chip_gen: v7x
topology: tpu7x:2x2x1
jax: 0.10.0
libtpu: 0.0.40
codegen_flags: <defaults>
</compile_context>

<pallas_src>
import functools

import jax
import jax.numpy as jnp
from jax.experimental import pallas as pl
from jax.experimental.pallas import tpu as pltpu

_EPS = 1e-5       # PyTorch BatchNorm2d default eps
_SUBLANE = 16     # bf16 sublane tile; channels are zero-padded to this


def _round_up(x, m):
    return (x + m - 1) // m * m


# ------------------------------ Pallas kernel --------------------------------


def _resblock_kernel(x_ref, w1_ref, w2_ref, g1_ref, b1_ref, g2_ref, b2_ref,
                     mask_ref, o_ref, ybuf_ref, *, wp, halo, rows_p, inv_count):
    """Fused ResidualBlock forward on a lane-dense (Cpad, rows) slab.

    x_ref    : (Cpad, ell) f32  zero-padded flattened NHW-padded input (+ halo)
    w*_ref   : (Cpad, 9*Cpad) bf16 tap-packed conv weights
    g*/b*_ref: (Cpad, 1) f32 BN affine params (zero in padded channels)
    mask_ref : (1, rows_p) f32, 1.0 at interior (non-padding) spatial positions
    o_ref    : (Cpad, rows_p) f32
    ybuf_ref : (Cpad, ell) bf16 VMEM scratch (y1 with re-attached zero halo)
    """
    cpad = x_ref.shape[0]
    ell = x_ref.shape[1]

    x_f32 = x_ref[...]                         # (Cpad, ell) f32
    x_bf = x_f32.astype(jnp.bfloat16)          # MXU operand dtype
    mask = mask_ref[...]                       # (1, rows_p)

    # 3x3 stencil taps: 9 lane-shifted windows stacked on the contraction
    # (sublane) axis.  Each slab is exactly one bf16 sublane tile (Cpad == 16)
    # so the concat is pure tile stacking.
    offs = [halo + (kh - 1) * wp + (kw - 1) for kh in range(3) for kw in range(3)]

    def taps(ext_bf16):
        return jnp.concatenate([ext_bf16[:, o:o + rows_p] for o in offs], axis=0)

    def bn_scale_shift(acc, gamma, beta):
        # Single-pass masked batch stats (biased, PyTorch training-mode).
        am = acc * mask
        s = jnp.sum(am, axis=-1, keepdims=True)
        q = jnp.sum(am * acc, axis=-1, keepdims=True)
        mean = s * inv_count
        var = q * inv_count - mean * mean
        scale = gamma * jax.lax.rsqrt(var + _EPS)   # EUP
        shift = beta - mean * scale
        return scale, shift

    # conv1 -> bn1 -> relu.  Single MXU matmul, K = 9*Cpad, bf16 in / f32 acc.
    acc1 = jnp.dot(w1_ref[...], taps(x_bf), preferred_element_type=jnp.float32)
    sc1, sh1 = bn_scale_shift(acc1, g1_ref[...], b1_ref[...])
    y1 = jnp.maximum(acc1 * sc1 + sh1, 0.0) * mask   # mask zeroes the pad ring

    # Re-attach the zero halo for conv2 via the VMEM scratch (no concat copy);
    # the interior writeback offset (halo) is a multiple of 128 -> lane aligned.
    ybuf_ref[...] = jnp.zeros_like(ybuf_ref)
    ybuf_ref[:, halo:halo + rows_p] = y1.astype(jnp.bfloat16)

    # conv2 -> bn2 -> + identity shortcut (f32) -> relu.
    acc2 = jnp.dot(w2_ref[...], taps(ybuf_ref[...]),
                   preferred_element_type=jnp.float32)
    sc2, sh2 = bn_scale_shift(acc2, g2_ref[...], b2_ref[...])
    y2 = acc2 * sc2 + sh2 + x_f32[:, halo:halo + rows_p]
    o_ref[...] = jnp.maximum(y2, 0.0)


# ------------------------------- JAX wrapper ---------------------------------


def _pack_conv_w(w_oihw, cpad):
    """(Cout, Cin, 3, 3) -> (Cpad, 9*Cpad) bf16, tap-major to match taps()."""
    cout, cin = w_oihw.shape[0], w_oihw.shape[1]
    wpad = jnp.pad(w_oihw.astype(jnp.float32),
                   ((0, cpad - cout), (0, cpad - cin), (0, 0), (0, 0)))
    return (jnp.transpose(wpad, (0, 2, 3, 1))
            .reshape(cpad, 9 * cpad).astype(jnp.bfloat16))


def _pad_bn(v, cpad):
    return jnp.pad(v.astype(jnp.float32), (0, cpad - v.shape[0])).reshape(cpad, 1)


@jax.jit
def residual_block_forward(x_nchw, params):
    """ResidualBlock forward (stride=1, in_channels == out_channels)."""
    x = x_nchw.astype(jnp.float32)
    n, cin, h, w = x.shape
    cout = params["conv1_w"].shape[0]
    assert cin == cout, "identity-shortcut configuration only"
    cpad = _round_up(max(cin, cout), _SUBLANE)

    hp, wp = h + 2, w + 2
    rows_p = n * hp * wp                     # flattened padded spatial positions
    halo = _round_up(wp + 1, 128)            # lane-aligned halo (>= wp+1)
    ell = rows_p + 2 * halo

    # NCHW -> channels-major flat zero-padded layout (Cpad, N*Hp*Wp) + halo,
    # built as one fused pad(transpose(.)) producer.
    xp = jnp.pad(jnp.transpose(x, (1, 0, 2, 3)),
                 ((0, cpad - cin), (0, 0), (1, 1), (1, 1)))
    x_ext = jnp.pad(xp.reshape(cpad, rows_p), ((0, 0), (halo, halo)))

    w1p = _pack_conv_w(params["conv1_w"], cpad)
    w2p = _pack_conv_w(params["conv2_w"], cpad)
    g1 = _pad_bn(params["bn1_gamma"], cpad)
    b1 = _pad_bn(params["bn1_beta"], cpad)
    g2 = _pad_bn(params["bn2_gamma"], cpad)
    b2 = _pad_bn(params["bn2_beta"], cpad)

    mask = jnp.pad(jnp.ones((n, h, w), jnp.float32),
                   ((0, 0), (1, 1), (1, 1))).reshape(1, rows_p)

    kernel = functools.partial(_resblock_kernel, wp=wp, halo=halo,
                               rows_p=rows_p, inv_count=1.0 / float(n * h * w))

    vmem = pl.BlockSpec(memory_space=pltpu.MemorySpace.VMEM)
    out_flat = pl.pallas_call(
        kernel,
        out_shape=jax.ShapeDtypeStruct((cpad, rows_p), jnp.float32),
        in_specs=[vmem] * 8,
        out_specs=vmem,
        scratch_shapes=[pltpu.VMEM((cpad, ell), jnp.bfloat16)],
        cost_estimate=pl.CostEstimate(
            flops=2 * (2 * cpad * 9 * cpad * rows_p),
            transcendentals=2 * cpad,
            bytes_accessed=(4 * cpad * ell                 # x (HBM in)
                            + 2 * 2 * cpad * 9 * cpad      # bf16 weights
                            + 4 * (4 * cpad + rows_p)      # bn params + mask
                            + 4 * cpad * rows_p            # output (HBM out)
                            + 2 * 2 * 9 * cpad * rows_p    # 9x tap replication
                            + 2 * 2 * cpad * ell)),        # y1 scratch traffic
    )(x_ext, w1p, w2p, g1, b1, g2, b2, mask)

    # Back to NCHW: drop padded channels and the spatial padding ring.
    out = out_flat.reshape(cpad, n, hp, wp)[:cout, :, 1:h + 1, 1:w + 1]
    return jnp.transpose(out, (1, 0, 2, 3))


# ----------------------------- pure-JAX reference ----------------------------


def _reference(x_nchw, params):
    def conv(x, w):
        return jax.lax.conv_general_dilated(
            x, w, window_strides=(1, 1), padding=((1, 1), (1, 1)),
            dimension_numbers=("NCHW", "OIHW", "NCHW"),
            precision=jax.lax.Precision.HIGHEST)

    def bn(x, g, b):
        mean = jnp.mean(x, axis=(0, 2, 3), keepdims=True)
        var = jnp.mean(jnp.square(x - mean), axis=(0, 2, 3), keepdims=True)
        return ((x - mean) * jax.lax.rsqrt(var + _EPS)
                * g.reshape(1, -1, 1, 1) + b.reshape(1, -1, 1, 1))

    out = jax.nn.relu(bn(conv(x_nchw, params["conv1_w"]),
                         params["bn1_gamma"], params["bn1_beta"]))
    out = bn(conv(out, params["conv2_w"]),
             params["bn2_gamma"], params["bn2_beta"])
    out = out + x_nchw  # identity shortcut
    return jax.nn.relu(out)


# ----------------------------------- main -------------------------------------


if __name__ == "__main__":
    key = jax.random.PRNGKey(0)
    ks = jax.random.split(key, 8)

    N, C, H, W = 2, 4, 16, 16  # in_channels == out_channels, stride=1

    params = {
        "conv1_w": 0.2 * jax.random.normal(ks[0], (C, C, 3, 3), jnp.float32),
        "conv2_w": 0.2 * jax.random.normal(ks[1], (C, C, 3, 3), jnp.float32),
        "bn1_gamma": 1.0 + 0.1 * jax.random.normal(ks[2], (C,), jnp.float32),
        "bn1_beta": 0.1 * jax.random.normal(ks[3], (C,), jnp.float32),
        "bn2_gamma": 1.0 + 0.1 * jax.random.normal(ks[4], (C,), jnp.float32),
        "bn2_beta": 0.1 * jax.random.normal(ks[5], (C,), jnp.float32),
    }

    x = jax.random.normal(ks[6], (N, C, H, W), jnp.float32)

    out = residual_block_forward(x, params)
    out = jax.block_until_ready(out)

    ref = _reference(x, params)
    assert out.shape == (N, C, H, W), out.shape

    # Tolerance derived for the bf16-MXU path: two chained bf16 (2^-8 rel)
    # 3x3 convs with BN renormalization -> expected max abs error ~1-2e-2,
    # mean abs error a few 1e-3, against the f32 HIGHEST-precision reference.
    max_err = float(jnp.max(jnp.abs(out - ref)))
    mean_err = float(jnp.mean(jnp.abs(out - ref)))
    assert max_err < 5e-2, ("max_err", max_err)
    assert mean_err < 1e-2, ("mean_err", mean_err)

    print("KERNEL_OK")
</pallas_src>

<mosaic_0001>
module attributes {stable_mosaic.version = 11 : i64} {
  func.func @_resblock_kernel(%arg0: memref<16x904xf32, #tpu.memory_space<vmem>>, %arg1: memref<16x144xbf16, #tpu.memory_space<vmem>>, %arg2: memref<16x144xbf16, #tpu.memory_space<vmem>>, %arg3: memref<16x1xf32, #tpu.memory_space<vmem>>, %arg4: memref<16x1xf32, #tpu.memory_space<vmem>>, %arg5: memref<16x1xf32, #tpu.memory_space<vmem>>, %arg6: memref<16x1xf32, #tpu.memory_space<vmem>>, %arg7: memref<1x648xf32, #tpu.memory_space<vmem>>, %arg8: memref<16x648xf32, #tpu.memory_space<vmem>>, %arg9: memref<16x904xbf16, #tpu.memory_space<vmem>>) attributes {dimension_semantics = [], scalar_prefetch = 0 : i64, scratch_operands = 1 : i64, tpu.core_type = #tpu.core_type<tc>} {
    %c0 = arith.constant 0 : index
    %c0_0 = arith.constant 0 : index
    %0 = vector.load %arg0[%c0, %c0_0] : memref<16x904xf32, #tpu.memory_space<vmem>>, vector<16x904xf32>
    %1 = arith.truncf %0 : vector<16x904xf32> to vector<16x904xbf16>
    %c0_1 = arith.constant 0 : index
    %c0_2 = arith.constant 0 : index
    %2 = vector.load %arg7[%c0_1, %c0_2] : memref<1x648xf32, #tpu.memory_space<vmem>>, vector<1x648xf32>
    %c0_3 = arith.constant 0 : index
    %c0_4 = arith.constant 0 : index
    %3 = vector.load %arg1[%c0_3, %c0_4] : memref<16x144xbf16, #tpu.memory_space<vmem>>, vector<16x144xbf16>
    %4 = vector.extract_strided_slice %1 {offsets = [0, 109], sizes = [16, 648], strides = [1, 1]} : vector<16x904xbf16> to vector<16x648xbf16>
    %5 = vector.extract_strided_slice %1 {offsets = [0, 110], sizes = [16, 648], strides = [1, 1]} : vector<16x904xbf16> to vector<16x648xbf16>
    %6 = vector.extract_strided_slice %1 {offsets = [0, 111], sizes = [16, 648], strides = [1, 1]} : vector<16x904xbf16> to vector<16x648xbf16>
    %7 = vector.extract_strided_slice %1 {offsets = [0, 127], sizes = [16, 648], strides = [1, 1]} : vector<16x904xbf16> to vector<16x648xbf16>
    %8 = vector.extract_strided_slice %1 {offsets = [0, 128], sizes = [16, 648], strides = [1, 1]} : vector<16x904xbf16> to vector<16x648xbf16>
    %9 = vector.extract_strided_slice %1 {offsets = [0, 129], sizes = [16, 648], strides = [1, 1]} : vector<16x904xbf16> to vector<16x648xbf16>
    %10 = vector.extract_strided_slice %1 {offsets = [0, 145], sizes = [16, 648], strides = [1, 1]} : vector<16x904xbf16> to vector<16x648xbf16>
    %11 = vector.extract_strided_slice %1 {offsets = [0, 146], sizes = [16, 648], strides = [1, 1]} : vector<16x904xbf16> to vector<16x648xbf16>
    %12 = vector.extract_strided_slice %1 {offsets = [0, 147], sizes = [16, 648], strides = [1, 1]} : vector<16x904xbf16> to vector<16x648xbf16>
    %13 = tpu.concatenate %4, %5, %6, %7, %8, %9, %10, %11, %12 in 0 : vector<16x648xbf16>, vector<16x648xbf16>, vector<16x648xbf16>, vector<16x648xbf16>, vector<16x648xbf16>, vector<16x648xbf16>, vector<16x648xbf16>, vector<16x648xbf16>, vector<16x648xbf16> -> vector<144x648xbf16>
    %cst = arith.constant dense<0.000000e+00> : vector<16x648xf32>
    %14 = tpu.matmul %3, %13, %cst {dimension_numbers = #tpu.dot_dimension_numbers<[1], [0], [0], [1], [0, 0, 1, 1], [], []>} : vector<16x144xbf16>, vector<144x648xbf16>, vector<16x648xf32> -> vector<16x648xf32>
    %c0_5 = arith.constant 0 : index
    %c0_6 = arith.constant 0 : index
    %15 = vector.load %arg3[%c0_5, %c0_6] : memref<16x1xf32, #tpu.memory_space<vmem>>, vector<16x1xf32>
    %c0_7 = arith.constant 0 : index
    %c0_8 = arith.constant 0 : index
    %16 = vector.load %arg4[%c0_7, %c0_8] : memref<16x1xf32, #tpu.memory_space<vmem>>, vector<16x1xf32>
    %17 = vector.broadcast %2 : vector<1x648xf32> to vector<16x648xf32>
    %18 = arith.mulf %14, %17 : vector<16x648xf32>
    %cst_9 = arith.constant dense<0.000000e+00> : vector<16xf32>
    %19 = vector.multi_reduction <add>, %18, %cst_9 [1] : vector<16x648xf32> to vector<16xf32>
    %20 = vector.shape_cast %19 : vector<16xf32> to vector<16x1xf32>
    %21 = arith.mulf %18, %14 : vector<16x648xf32>
    %cst_10 = arith.constant dense<0.000000e+00> : vector<16xf32>
    %22 = vector.multi_reduction <add>, %21, %cst_10 [1] : vector<16x648xf32> to vector<16xf32>
    %23 = vector.shape_cast %22 : vector<16xf32> to vector<16x1xf32>
    %cst_11 = arith.constant 0.001953125 : f32
    %24 = vector.broadcast %cst_11 : f32 to vector<16x1xf32>
    %25 = arith.mulf %20, %24 : vector<16x1xf32>
    %cst_12 = arith.constant 0.001953125 : f32
    %26 = vector.broadcast %cst_12 : f32 to vector<16x1xf32>
    %27 = arith.mulf %23, %26 : vector<16x1xf32>
    %28 = arith.mulf %25, %25 : vector<16x1xf32>
    %29 = arith.subf %27, %28 : vector<16x1xf32>
    %cst_13 = arith.constant 9.99999974E-6 : f32
    %30 = vector.broadcast %cst_13 : f32 to vector<16x1xf32>
    %31 = arith.addf %29, %30 : vector<16x1xf32>
    %32 = math.rsqrt %31 : vector<16x1xf32>
    %33 = arith.mulf %15, %32 : vector<16x1xf32>
    %34 = arith.mulf %25, %33 : vector<16x1xf32>
    %35 = arith.subf %16, %34 : vector<16x1xf32>
    %36 = vector.broadcast %33 : vector<16x1xf32> to vector<16x648xf32>
    %37 = arith.mulf %14, %36 : vector<16x648xf32>
    %38 = vector.broadcast %35 : vector<16x1xf32> to vector<16x648xf32>
    %39 = arith.addf %37, %38 : vector<16x648xf32>
    %cst_14 = arith.constant 0.000000e+00 : f32
    %40 = vector.broadcast %cst_14 : f32 to vector<16x648xf32>
    %41 = arith.maximumf %39, %40 : vector<16x648xf32>
    %42 = vector.broadcast %2 : vector<1x648xf32> to vector<16x648xf32>
    %43 = arith.mulf %41, %42 : vector<16x648xf32>
    %cst_15 = arith.constant 0.000000e+00 : bf16
    %44 = vector.broadcast %cst_15 : bf16 to vector<16x904xbf16>
    %c0_16 = arith.constant 0 : index
    %c0_17 = arith.constant 0 : index
    %45 = vector.load %arg9[%c0_16, %c0_17] : memref<16x904xbf16, #tpu.memory_space<vmem>>, vector<16x904xbf16>
    tpu.vector_store %arg9[%c0_16, %c0_17], %44 {strides = array<i32>} : memref<16x904xbf16, #tpu.memory_space<vmem>>, vector<16x904xbf16>,
    %46 = arith.truncf %43 : vector<16x648xf32> to vector<16x648xbf16>
    %c0_18 = arith.constant 0 : index
    %c128 = arith.constant 128 : index
    %47 = vector.load %arg9[%c0_18, %c128] : memref<16x904xbf16, #tpu.memory_space<vmem>>, vector<16x648xbf16>
    tpu.vector_store %arg9[%c0_18, %c128], %46 {strides = array<i32>} : memref<16x904xbf16, #tpu.memory_space<vmem>>, vector<16x648xbf16>,
    %c0_19 = arith.constant 0 : index
    %c0_20 = arith.constant 0 : index
    %48 = vector.load %arg2[%c0_19, %c0_20] : memref<16x144xbf16, #tpu.memory_space<vmem>>, vector<16x144xbf16>
    %c0_21 = arith.constant 0 : index
    %c0_22 = arith.constant 0 : index
    %49 = vector.load %arg9[%c0_21, %c0_22] : memref<16x904xbf16, #tpu.memory_space<vmem>>, vector<16x904xbf16>
    %50 = vector.extract_strided_slice %49 {offsets = [0, 109], sizes = [16, 648], strides = [1, 1]} : vector<16x904xbf16> to vector<16x648xbf16>
    %51 = vector.extract_strided_slice %49 {offsets = [0, 110], sizes = [16, 648], strides = [1, 1]} : vector<16x904xbf16> to vector<16x648xbf16>
    %52 = vector.extract_strided_slice %49 {offsets = [0, 111], sizes = [16, 648], strides = [1, 1]} : vector<16x904xbf16> to vector<16x648xbf16>
    %53 = vector.extract_strided_slice %49 {offsets = [0, 127], sizes = [16, 648], strides = [1, 1]} : vector<16x904xbf16> to vector<16x648xbf16>
    %54 = vector.extract_strided_slice %49 {offsets = [0, 128], sizes = [16, 648], strides = [1, 1]} : vector<16x904xbf16> to vector<16x648xbf16>
    %55 = vector.extract_strided_slice %49 {offsets = [0, 129], sizes = [16, 648], strides = [1, 1]} : vector<16x904xbf16> to vector<16x648xbf16>
    %56 = vector.extract_strided_slice %49 {offsets = [0, 145], sizes = [16, 648], strides = [1, 1]} : vector<16x904xbf16> to vector<16x648xbf16>
    %57 = vector.extract_strided_slice %49 {offsets = [0, 146], sizes = [16, 648], strides = [1, 1]} : vector<16x904xbf16> to vector<16x648xbf16>
    %58 = vector.extract_strided_slice %49 {offsets = [0, 147], sizes = [16, 648], strides = [1, 1]} : vector<16x904xbf16> to vector<16x648xbf16>
    %59 = tpu.concatenate %50, %51, %52, %53, %54, %55, %56, %57, %58 in 0 : vector<16x648xbf16>, vector<16x648xbf16>, vector<16x648xbf16>, vector<16x648xbf16>, vector<16x648xbf16>, vector<16x648xbf16>, vector<16x648xbf16>, vector<16x648xbf16>, vector<16x648xbf16> -> vector<144x648xbf16>
    %cst_23 = arith.constant dense<0.000000e+00> : vector<16x648xf32>
    %60 = tpu.matmul %48, %59, %cst_23 {dimension_numbers = #tpu.dot_dimension_numbers<[1], [0], [0], [1], [0, 0, 1, 1], [], []>} : vector<16x144xbf16>, vector<144x648xbf16>, vector<16x648xf32> -> vector<16x648xf32>
    %c0_24 = arith.constant 0 : index
    %c0_25 = arith.constant 0 : index
    %61 = vector.load %arg5[%c0_24, %c0_25] : memref<16x1xf32, #tpu.memory_space<vmem>>, vector<16x1xf32>
    %c0_26 = arith.constant 0 : index
    %c0_27 = arith.constant 0 : index
    %62 = vector.load %arg6[%c0_26, %c0_27] : memref<16x1xf32, #tpu.memory_space<vmem>>, vector<16x1xf32>
    %63 = vector.broadcast %2 : vector<1x648xf32> to vector<16x648xf32>
    %64 = arith.mulf %60, %63 : vector<16x648xf32>
    %cst_28 = arith.constant dense<0.000000e+00> : vector<16xf32>
    %65 = vector.multi_reduction <add>, %64, %cst_28 [1] : vector<16x648xf32> to vector<16xf32>
    %66 = vector.shape_cast %65 : vector<16xf32> to vector<16x1xf32>
    %67 = arith.mulf %64, %60 : vector<16x648xf32>
    %cst_29 = arith.constant dense<0.000000e+00> : vector<16xf32>
    %68 = vector.multi_reduction <add>, %67, %cst_29 [1] : vector<16x648xf32> to vector<16xf32>
    %69 = vector.shape_cast %68 : vector<16xf32> to vector<16x1xf32>
    %cst_30 = arith.constant 0.001953125 : f32
    %70 = vector.broadcast %cst_30 : f32 to vector<16x1xf32>
    %71 = arith.mulf %66, %70 : vector<16x1xf32>
    %cst_31 = arith.constant 0.001953125 : f32
    %72 = vector.broadcast %cst_31 : f32 to vector<16x1xf32>
    %73 = arith.mulf %69, %72 : vector<16x1xf32>
    %74 = arith.mulf %71, %71 : vector<16x1xf32>
    %75 = arith.subf %73, %74 : vector<16x1xf32>
    %cst_32 = arith.constant 9.99999974E-6 : f32
    %76 = vector.broadcast %cst_32 : f32 to vector<16x1xf32>
    %77 = arith.addf %75, %76 : vector<16x1xf32>
    %78 = math.rsqrt %77 : vector<16x1xf32>
    %79 = arith.mulf %61, %78 : vector<16x1xf32>
    %80 = arith.mulf %71, %79 : vector<16x1xf32>
    %81 = arith.subf %62, %80 : vector<16x1xf32>
    %82 = vector.broadcast %79 : vector<16x1xf32> to vector<16x648xf32>
    %83 = arith.mulf %60, %82 : vector<16x648xf32>
    %84 = vector.broadcast %81 : vector<16x1xf32> to vector<16x648xf32>
    %85 = arith.addf %83, %84 : vector<16x648xf32>
    %86 = vector.extract_strided_slice %0 {offsets = [0, 128], sizes = [16, 648], strides = [1, 1]} : vector<16x904xf32> to vector<16x648xf32>
    %87 = arith.addf %85, %86 : vector<16x648xf32>
    %cst_33 = arith.constant 0.000000e+00 : f32
    %88 = vector.broadcast %cst_33 : f32 to vector<16x648xf32>
    %89 = arith.maximumf %87, %88 : vector<16x648xf32>
    %c0_34 = arith.constant 0 : index
    %c0_35 = arith.constant 0 : index
    %90 = vector.load %arg8[%c0_34, %c0_35] : memref<16x648xf32, #tpu.memory_space<vmem>>, vector<16x648xf32>
    tpu.vector_store %arg8[%c0_34, %c0_35], %89 {strides = array<i32>} : memref<16x648xf32, #tpu.memory_space<vmem>>, vector<16x648xf32>,
    return
  }
}

</mosaic_0001>

<bundles_post_ra>
// kernel: residual_block_forward.1
= control target key start
LH: loop header
LB: loop body
LE: loop exit
PB: predicated region body
PF: predicated region fallthrough
CT: control target
= control target key end

     0   :  { %s1469_s21 = smov 127   ;;  %s1470_s22 = smov 126   ;;  %vm72_vm0 = vcmask 1039360   ;;  %vm90_vm1 = vcmask 1031168   ;;  %vm111_vm2 = vcmask 900096   ;;  %vm130_vm3 = vcmask 891904   ;;  %s2572_s0 = inlined_call_operand.vmem [shape: f32[16,904], index: 0, kind: input, shape index: {}]   ;;  %s2573_s1 = inlined_call_operand.vmem [shape: bf16[16,144], index: 1, kind: input, shape index: {}]   ;;  %s2574_s7 = inlined_call_operand.vmem [shape: f32[1,648], index: 7, kind: input, shape index: {}]   ;;  %s2575_s3 = inlined_call_operand.vmem [shape: f32[16,1], index: 3, kind: input, shape index: {}]   ;;  %s2576_s4 = inlined_call_operand.vmem [shape: f32[16,1], index: 4, kind: input, shape index: {}]   ;;  %s2577_s2 = inlined_call_operand.vmem [shape: bf16[16,144], index: 2, kind: input, shape index: {}]   ;;  %s2578_s5 = inlined_call_operand.vmem [shape: f32[16,1], index: 5, kind: input, shape index: {}]   ;;  %s2579_s6 = inlined_call_operand.vmem [shape: f32[16,1], index: 6, kind: input, shape index: {}]   ;;  %s2580_s8 = inlined_call_operand.vmem [shape: f32[16,648], index: 8, kind: output, shape index: {}]  }
   0x1   :  { %v33_v0 = vld [vmem:[%s2572_s0 + $0x18] sm:$0xff]  ;;  %v31_v2 = vld [vmem:[%s2572_s0 + $0x8] sm:$0xff]  ;;  %v32_v5 = vld [vmem:[%s2572_s0 + $0x10] sm:$0xff]  ;;  %s1471_s23 = smov 110   ;;  %s1472_s24 = smov 109   ;;  %vm148_vm4 = vcmask 883712  }
   0x2   :  { %v40_v1 = vld [vmem:[%s2572_s0 + $0x58] sm:$0xff]  ;;  %v38_v4 = vld [vmem:[%s2572_s0 + $0x48] sm:$0xff]  ;;  %v39_v6 = vld [vmem:[%s2572_s0 + $0x50] sm:$0xff]  ;;  %s1473_s25 = smov 108   ;;  %s1474_s26 = smov 92   ;;  %vm166_vm5 = vcmask 752640  }
   0x3   :  { %v1533_v3 = vpack.c.bf16 %v40_v1, %v33_v0  ;;  %v1544_v7 = vpack.c.bf16 %v38_v4, %v31_v2  ;;  %v30_v8 = vld [vmem:[%s2572_s0] sm:$0xff]  ;;  %v46_v11 = vpack.c.bf16 %v39_v6, %v32_v5  ;;  %s1475_s27 = smov 91   ;;  %s1476_s10 = smov 90   ;;  %v35_v15 = vld [vmem:[%s2572_s0 + $0x28] sm:$0xff]  ;;  %v36_v18 = vld [vmem:[%s2572_s0 + $0x30] sm:$0xff]  ;;  %vm184_vm6 = vcmask 744448  }
   0x4   :  { %v37_v9 = vld [vmem:[%s2572_s0 + $0x40] sm:$0xff]  ;;  %v42_v16 = vld [vmem:[%s2572_s0 + $0x68] sm:$0xff]  ;;  %v43_v19 = vld [vmem:[%s2572_s0 + $0x70] sm:$0xff]  ;;  %s1477_s19 = smov 19   ;;  %vm202_vm7 = vcmask 736256   ;;  %vm425_vm8 = vcmask 130048  }
   0x5   :  { %66 = vrot.lane.b32.xlu1 %v1533_v3, %s1469_s21  ;;  %v1554_v10 = vpack.c.bf16 %v37_v9, %v30_v8  ;;  %62 = vrot.lane.b32.xlu0 %v1544_v7, %s1469_s21  ;;  %v34_v12 = vld [vmem:[%s2572_s0 + $0x20] sm:$0xff]  ;;  %v1616_v17 = vpack.c.bf16 %v42_v16, %v35_v15  ;;  %v50_v20 = vpack.c.bf16 %v43_v19, %v36_v18  ;;  %vm325_vm9 = vcmask 154624  }
   0x6   :  { %v41_v13 = vld [vmem:[%s2572_s0 + $0x60] sm:$0xff]  ;;  %vm609_vm10 = vcmask 64512  }
   0x7   :  { %v1602_v14 = vpack.c.bf16 %v41_v13, %v34_v12  ;;  %v1732_v4 = vld [vmem:[%s2573_s1 + $0x4] ss:$8 sps:$4 sm:$0xff]  }
   0x8   :  { %1423 = vmatprep.mubr.msk.bf16.mxu0 %vm425_vm8, %v1732_v4  ;;  %1424 = vmatprep.mubr.msk.bf16.mxu1 %vm425_vm8, %v1732_v4 }
   0x9   :  { %60 = vrot.lane.b32.xlu1 %v1554_v10, %s1469_s21  ;;  %64 = vrot.lane.b32.xlu0 %v46_v11, %s1469_s21 }
   0xd   :  { %82 = vrot.lane.b32.xlu1 %v46_v11, %s1470_s22  ;;  %80 = vrot.lane.b32.xlu0 %v1544_v7, %s1470_s22 }
  0x11   :  { %78 = vrot.lane.b32.xlu1 %v1554_v10, %s1470_s22  ;;  %84 = vrot.lane.b32.xlu0 %v1533_v3, %s1470_s22 }
  0x15   :  { %101 = vrot.lane.b32.xlu1 %v46_v11, %s1471_s23  ;;  %99 = vrot.lane.b32.xlu0 %v1544_v7, %s1471_s23 }
  0x19   :  { %97 = vrot.lane.b32.xlu1 %v1554_v10, %s1471_s23  ;;  %103 = vrot.lane.b32.xlu0 %v1533_v3, %s1471_s23 }
  0x1d   :  { %120 = vrot.lane.b32.xlu1 %v46_v11, %s1472_s24  ;;  %118 = vrot.lane.b32.xlu0 %v1544_v7, %s1472_s24 }
  0x21   :  { %136 = vrot.lane.b32.xlu1 %v1544_v7, %s1473_s25  ;;  %122 = vrot.lane.b32.xlu0 %v1533_v3, %s1472_s24 }
  0x25   :  { %140 = vrot.lane.b32.xlu1 %v1533_v3, %s1473_s25  ;;  %138 = vrot.lane.b32.xlu0 %v46_v11, %s1473_s25 }
  0x29   :  { %156 = vrot.lane.b32.xlu1 %v46_v11, %s1474_s26  ;;  %154 = vrot.lane.b32.xlu0 %v1544_v7, %s1474_s26 }
  0x2d   :  { %172 = vrot.lane.b32.xlu1 %v1544_v7, %s1475_s27  ;;  %158 = vrot.lane.b32.xlu0 %v1533_v3, %s1474_s26 }
  0x31   :  { %176 = vrot.lane.b32.xlu1 %v1533_v3, %s1475_s27  ;;  %174 = vrot.lane.b32.xlu0 %v46_v11, %s1475_s27 }
  0x35   :  { %192 = vrot.lane.b32.xlu1 %v46_v11, %s1476_s10  ;;  %190 = vrot.lane.b32.xlu0 %v1544_v7, %s1476_s10 }
  0x39   :  { %68 = vrot.lane.b32.xlu1 %v1602_v14, %s1469_s21  ;;  %194 = vrot.lane.b32.xlu0 %v1533_v3, %s1476_s10 }
  0x3d   :  { %86 = vrot.lane.b32.xlu1 %v1602_v14, %s1470_s22  ;;  %70 = vrot.lane.b32.xlu0 %v1616_v17, %s1469_s21 }
  0x41   :  { %105 = vrot.lane.b32.xlu1 %v1602_v14, %s1471_s23  ;;  %88 = vrot.lane.b32.xlu0 %v1616_v17, %s1470_s22 }
  0x45   :  { %124 = vrot.lane.b32.xlu1 %v1602_v14, %s1472_s24  ;;  %107 = vrot.lane.b32.xlu0 %v1616_v17, %s1471_s23 }
  0x49   :  { %109 = vrot.lane.b32.xlu1 %v50_v20, %s1471_s23  ;;  %126 = vrot.lane.b32.xlu0 %v1616_v17, %s1472_s24 }
  0x4d   :  { %144 = vrot.lane.b32.xlu1 %v1616_v17, %s1473_s25  ;;  %142 = vrot.lane.b32.xlu0 %v1602_v14, %s1473_s25 }
  0x51   :  { %160 = vrot.lane.b32.xlu1 %v1602_v14, %s1474_s26  ;;  %128 = vrot.lane.b32.xlu0 %v50_v20, %s1472_s24 }
  0x55   :  { %146 = vrot.lane.b32.xlu1 %v50_v20, %s1473_s25  ;;  %162 = vrot.lane.b32.xlu0 %v1616_v17, %s1474_s26 }
  0x59   :  { %221 = vrot.lane.b32.xlu1 %v46_v11, %s1477_s19  ;;  %219 = vrot.lane.b32.xlu0 %v1544_v7, %s1477_s19 }
  0x5d   :  { %180 = vrot.lane.b32.xlu1 %v1616_v17, %s1475_s27  ;;  %178 = vrot.lane.b32.xlu0 %v1602_v14, %s1475_s27 }
  0x61   :  { %164 = vrot.lane.b32.xlu1 %v50_v20, %s1474_s26  ;;  %217 = vrot.lane.b32.xlu0 %v1554_v10, %s1477_s19 }
  0x65   :  { %198 = vrot.lane.b32.xlu1 %v1616_v17, %s1476_s10  ;;  %196 = vrot.lane.b32.xlu0 %v1602_v14, %s1476_s10 }
  0x69   :  { %182 = vrot.lane.b32.xlu1 %v50_v20, %s1475_s27 }
  0x6d   :  { %200 = vrot.lane.b32.xlu1 %v50_v20, %s1476_s10 }
  0x77   :  { %v1665_v21 = vpop.permute.xlu1 %66  ;;  %v63_v22 = vpop.permute.xlu0 %62 }
  0x7b   :  { %v61_v23 = vpop.permute.xlu1 %60  ;;  %v65_v24 = vpop.permute.xlu0 %64 }
  0x7c   :  { %v74_v25 = vsel %vm72_vm0, %v63_v22, %v65_v24  ;;  %v75_v26 = vsel %vm72_vm0, %v65_v24, %v1665_v21  ;;  %v73_v29 = vsel %vm72_vm0, %v61_v23, %v63_v22 }
  0x7d   :  { %231 = vrot.lane.b32.xlu0 %v74_v25, %s1477_s19  ;;  %233 = vrot.lane.b32.xlu1 %v75_v26, %s1477_s19 }
  0x7f   :  { %v83_v27 = vpop.permute.xlu1 %82  ;;  %v81_v28 = vpop.permute.xlu0 %80 }
  0x80   :  { %v92_v33 = vsel %vm90_vm1, %v81_v28, %v83_v27 }
  0x81   :  { %229 = vrot.lane.b32.xlu0 %v73_v29, %s1477_s19 }
  0x83   :  { %v79_v30 = vpop.permute.xlu1 %78  ;;  %v1674_v31 = vpop.permute.xlu0 %84 }
  0x84   :  { %v93_v32 = vsel %vm90_vm1, %v83_v27, %v1674_v31  ;;  %v91_v36 = vsel %vm90_vm1, %v79_v30, %v81_v28 }
  0x85   :  { %245 = vrot.lane.b32.xlu1 %v93_v32, %s1477_s19  ;;  %243 = vrot.lane.b32.xlu0 %v92_v33, %s1477_s19 }
  0x87   :  { %v102_v34 = vpop.permute.xlu1 %101  ;;  %v100_v35 = vpop.permute.xlu0 %99 }
  0x88   :  { %v113_v40 = vsel %vm111_vm2, %v100_v35, %v102_v34 }
  0x89   :  { %241 = vrot.lane.b32.xlu0 %v91_v36, %s1477_s19 }
  0x8b   :  { %v98_v37 = vpop.permute.xlu1 %97  ;;  %v1683_v38 = vpop.permute.xlu0 %103 }
  0x8c   :  { %v114_v39 = vsel %vm111_vm2, %v102_v34, %v1683_v38  ;;  %v112_v43 = vsel %vm111_vm2, %v98_v37, %v100_v35 }
  0x8d   :  { %257 = vrot.lane.b32.xlu1 %v114_v39, %s1477_s19  ;;  %255 = vrot.lane.b32.xlu0 %v113_v40, %s1477_s19 }
  0x8f   :  { %v121_v41 = vpop.permute.xlu1 %120  ;;  %v119_v42 = vpop.permute.xlu0 %118 }
  0x90   :  { %v131_v44 = vsel %vm130_vm3, %v119_v42, %v121_v41 }
  0x91   :  { %253 = vrot.lane.b32.xlu0 %v112_v43, %s1477_s19  ;;  %267 = vrot.lane.b32.xlu1 %v131_v44, %s1477_s19 }
  0x93   :  { %v137_v45 = vpop.permute.xlu1 %136  ;;  %v1694_v46 = vpop.permute.xlu0 %122 }
  0x94   :  { %v132_v47 = vsel %vm130_vm3, %v121_v41, %v1694_v46 }
  0x95   :  { %269 = vrot.lane.b32.xlu0 %v132_v47, %s1477_s19  ;;  %265 = vrot.lane.b32.xlu1 %v119_v42, %s1477_s19 }
  0x97   :  { %v1700_v48 = vpop.permute.xlu1 %140  ;;  %v139_v49 = vpop.permute.xlu0 %138 }
  0x98   :  { %v149_v50 = vsel %vm148_vm4, %v137_v45, %v139_v49  ;;  %v150_v51 = vsel %vm148_vm4, %v139_v49, %v1700_v48 }
  0x99   :  { %279 = vrot.lane.b32.xlu0 %v149_v50, %s1477_s19  ;;  %281 = vrot.lane.b32.xlu1 %v150_v51, %s1477_s19 }
  0x9b   :  { %v157_v52 = vpop.permute.xlu1 %156  ;;  %v155_v53 = vpop.permute.xlu0 %154 }
  0x9c   :  { %v167_v54 = vsel %vm166_vm5, %v155_v53, %v157_v52 }
  0x9d   :  { %277 = vrot.lane.b32.xlu0 %v137_v45, %s1477_s19  ;;  %291 = vrot.lane.b32.xlu1 %v167_v54, %s1477_s19 }
  0x9f   :  { %v173_v55 = vpop.permute.xlu1 %172  ;;  %v1710_v56 = vpop.permute.xlu0 %158 }
  0xa0   :  { %v168_v57 = vsel %vm166_vm5, %v157_v52, %v1710_v56 }
  0xa1   :  { %293 = vrot.lane.b32.xlu0 %v168_v57, %s1477_s19  ;;  %289 = vrot.lane.b32.xlu1 %v155_v53, %s1477_s19 }
  0xa3   :  { %v1716_v58 = vpop.permute.xlu1 %176  ;;  %v175_v59 = vpop.permute.xlu0 %174 }
  0xa4   :  { %v185_v60 = vsel %vm184_vm6, %v173_v55, %v175_v59  ;;  %v186_v61 = vsel %vm184_vm6, %v175_v59, %v1716_v58 }
  0xa5   :  { %303 = vrot.lane.b32.xlu0 %v185_v60, %s1477_s19  ;;  %305 = vrot.lane.b32.xlu1 %v186_v61, %s1477_s19 }
  0xa7   :  { %v193_v62 = vpop.permute.xlu1 %192  ;;  %v191_v63 = vpop.permute.xlu0 %190 }
  0xa8   :  { %v203_v1 = vsel %vm202_vm7, %v191_v63, %v193_v62 }
  0xa9   :  { %301 = vrot.lane.b32.xlu0 %v173_v55, %s1477_s19  ;;  %223 = vrot.lane.b32.xlu1 %v1533_v3, %s1477_s19 }
  0xab   :  { %v69_v0 = vpop.permute.xlu1 %68  ;;  %v1727_v2 = vpop.permute.xlu0 %194 }
  0xac   :  { %v204_v6 = vsel %vm202_vm7, %v193_v62, %v1727_v2  ;;  %v76_v10 = vsel %vm72_vm0, %v1665_v21, %v69_v0 }
  0xad   :  { %225 = vrot.lane.b32.xlu0 %v1602_v14, %s1477_s19  ;;  %315 = vrot.lane.b32.xlu1 %v203_v1, %s1477_s19 }
  0xaf   :  { %v87_v5 = vpop.permute.xlu1 %86  ;;  %v71_v3 = vpop.permute.xlu0 %70 }
  0xb0   :  { %v77_v9 = vsel %vm72_vm0, %v69_v0, %v71_v3  ;;  %v94_v13 = vsel %vm90_vm1, %v1674_v31, %v87_v5 }
  0xb1   :  { %317 = vrot.lane.b32.xlu0 %v204_v6, %s1477_s19  ;;  %313 = vrot.lane.b32.xlu1 %v191_v63, %s1477_s19 }
  0xb3   :  { %v106_v7 = vpop.permute.xlu1 %105  ;;  %v89_v8 = vpop.permute.xlu0 %88 }
  0xb4   :  { %v95_v16 = vsel %vm90_vm1, %v87_v5, %v89_v8  ;;  %v115_v21 = vsel %vm111_vm2, %v1683_v38, %v106_v7 }
  0xb5   :  { %237 = vrot.lane.b32.xlu1 %v77_v9, %s1477_s19  ;;  %235 = vrot.lane.b32.xlu0 %v76_v10, %s1477_s19 }
  0xb7   :  { %v125_v11 = vpop.permute.xlu1 %124  ;;  %v108_v12 = vpop.permute.xlu0 %107 }
  0xb8   :  { %v116_v20 = vsel %vm111_vm2, %v106_v7, %v108_v12  ;;  %v133_v23 = vsel %vm130_vm3, %v1694_v46, %v125_v11 }
  0xb9   :  { %227 = vrot.lane.b32.xlu0 %v1616_v17, %s1477_s19  ;;  %247 = vrot.lane.b32.xlu1 %v94_v13, %s1477_s19 }
  0xbb   :  { %v110_v14 = vpop.permute.xlu1 %109  ;;  %v127_v15 = vpop.permute.xlu0 %126 }
  0xbc   :  { %v134_v26 = vsel %vm130_vm3, %v125_v11, %v127_v15  ;;  %v117_v27 = vsel %vm111_vm2, %v108_v12, %v110_v14 }
  0xbd   :  { %249 = vrot.lane.b32.xlu0 %v95_v16, %s1477_s19  ;;  %239 = vrot.lane.b32.xlu1 %v71_v3, %s1477_s19 }
  0xbf   :  { %v145_v18 = vpop.permute.xlu1 %144  ;;  %v143_v19 = vpop.permute.xlu0 %142 }
  0xc0   :  { %v151_v30 = vsel %vm148_vm4, %v1700_v48, %v143_v19  ;;  %v152_v31 = vsel %vm148_vm4, %v143_v19, %v145_v18 }
  0xc1   :  { %261 = vrot.lane.b32.xlu1 %v116_v20, %s1477_s19  ;;  %259 = vrot.lane.b32.xlu0 %v115_v21, %s1477_s19 }
  0xc3   :  { %v161_v17 = vpop.permute.xlu1 %160  ;;  %v129_v22 = vpop.permute.xlu0 %128 }
  0xc4   :  { %v135_v35 = vsel %vm130_vm3, %v127_v15, %v129_v22  ;;  %v169_v36 = vsel %vm166_vm5, %v1710_v56, %v161_v17 }
  0xc5   :  { %251 = vrot.lane.b32.xlu0 %v89_v8, %s1477_s19  ;;  %271 = vrot.lane.b32.xlu1 %v133_v23, %s1477_s19 }
  0xc7   :  { %v147_v24 = vpop.permute.xlu1 %146  ;;  %v163_v25 = vpop.permute.xlu0 %162 }
  0xc8   :  { %v170_v39 = vsel %vm166_vm5, %v161_v17, %v163_v25  ;;  %v153_v40 = vsel %vm148_vm4, %v145_v18, %v147_v24 }
  0xc9   :  { %273 = vrot.lane.b32.xlu0 %v134_v26, %s1477_s19  ;;  %263 = vrot.lane.b32.xlu1 %v117_v27, %s1477_s19 }
  0xcb   :  { %v1771_v28 = vpop.permute.xlu1 %221  ;;  %v220_v29 = vpop.permute.xlu0 %219 }
  0xcc   :  { %v327_v32 = vsel %vm325_vm9, %v220_v29, %v1771_v28 }
  0xcd   :  { %283 = vrot.lane.b32.xlu0 %v151_v30, %s1477_s19  ;;  %285 = vrot.lane.b32.xlu1 %v152_v31, %s1477_s19 }
  0xce   :  { %429 = vmatprep.subr.bf16.mxu0 %v327_v32 }
  0xcf   :  { %v181_v33 = vpop.permute.xlu1 %180  ;;  %v179_v34 = vpop.permute.xlu0 %178 }
  0xd0   :  { %v187_v43 = vsel %vm184_vm6, %v1716_v58, %v179_v34  ;;  %v188_v44 = vsel %vm184_vm6, %v179_v34, %v181_v33 }
  0xd1   :  { %275 = vrot.lane.b32.xlu0 %v135_v35, %s1477_s19  ;;  %295 = vrot.lane.b32.xlu1 %v169_v36, %s1477_s19  ;;  %v1852_v35 = vld [vmem:[%s2573_s1] ss:$8 sps:$4 sm:$0xff]  }
  0xd3   :  { %v165_v37 = vpop.permute.xlu1 %164  ;;  %v218_v38 = vpop.permute.xlu0 %217 }
  0xd4   :  { %v326_v41 = vsel %vm325_vm9, %v218_v38, %v220_v29  ;;  %v171_v47 = vsel %vm166_vm5, %v163_v25, %v165_v37 }
  0xd5   :  { %297 = vrot.lane.b32.xlu0 %v170_v39, %s1477_s19  ;;  %287 = vrot.lane.b32.xlu1 %v153_v40, %s1477_s19 }
  0xd6   :  { %430 = vmatpush1.bf16.msra.mxu0 %v326_v41 }
  0xd7   :  { %v199_v42 = vpop.permute.xlu1 %198  ;;  %v197_v45 = vpop.permute.xlu0 %196 }
  0xd8   :  { %v205_v48 = vsel %vm202_vm7, %v1727_v2, %v197_v45  ;;  %v206_v50 = vsel %vm202_vm7, %v197_v45, %v199_v42 }
  0xd9   :  { %307 = vrot.lane.b32.xlu0 %v187_v43, %s1477_s19  ;;  %309 = vrot.lane.b32.xlu1 %v188_v44, %s1477_s19 }
  0xdb   :  { %v183_v46 = vpop.permute.xlu1 %182 }
  0xdc   :  { %v189_v49 = vsel %vm184_vm6, %v181_v33, %v183_v46 }
  0xdd   :  { %319 = vrot.lane.b32.xlu1 %v205_v48, %s1477_s19  ;;  %299 = vrot.lane.b32.xlu0 %v171_v47, %s1477_s19 }
  0xdf   :  { %v201_v51 = vpop.permute.xlu1 %200 }
  0xe0   :  { %v207_v52 = vsel %vm202_vm7, %v199_v42, %v201_v51 }
  0xe1   :  { %321 = vrot.lane.b32.xlu0 %v206_v50, %s1477_s19  ;;  %311 = vrot.lane.b32.xlu1 %v189_v49, %s1477_s19 }
  0xe5   :  { %323 = vrot.lane.b32.xlu0 %v207_v52, %s1477_s19 }
  0xef   :  { %v232_v53 = vpop.permute.xlu0 %231  ;;  %v1806_v54 = vpop.permute.xlu1 %233 }
  0xf0   :  { %v332_v55 = vsel %vm325_vm9, %v232_v53, %v1806_v54 }
  0xf1   :  { %431 = vmatprep.subr.bf16.mxu0 %v332_v55 }
  0xf3   :  { %v230_v56 = vpop.permute.xlu0 %229 }
  0xf4   :  { %v331_v57 = vsel %vm325_vm9, %v230_v56, %v232_v53 }
  0xf5   :  { %432 = vmatpush1.bf16.msra.mxu0 %v331_v57 }
  0xf7   :  { %v244_v58 = vpop.permute.xlu0 %243  ;;  %v1811_v59 = vpop.permute.xlu1 %245 }
  0xf8   :  { %v337_v60 = vsel %vm325_vm9, %v244_v58, %v1811_v59 }
  0xf9   :  { %433 = vmatprep.subr.bf16.mxu0 %v337_v60 }
  0xfb   :  { %v242_v61 = vpop.permute.xlu0 %241 }
  0xfc   :  { %v336_v62 = vsel %vm325_vm9, %v242_v61, %v244_v58 }
  0xfd   :  { %434 = vmatpush1.bf16.msra.mxu0 %v336_v62 }
  0xff   :  { %v256_v63 = vpop.permute.xlu0 %255  ;;  %v1816_v0 = vpop.permute.xlu1 %257 }
 0x100   :  { %v342_v1 = vsel %vm325_vm9, %v256_v63, %v1816_v0 }
 0x101   :  { %435 = vmatprep.subr.bf16.mxu0 %v342_v1 }
 0x103   :  { %v254_v2 = vpop.permute.xlu0 %253  ;;  %v268_v5 = vpop.permute.xlu1 %267 }
 0x104   :  { %v341_v3 = vsel %vm325_vm9, %v254_v2, %v256_v63 }
 0x105   :  { %436 = vmatpush1.bf16.msra.mxu0 %v341_v3 }
 0x107   :  { %v1821_v6 = vpop.permute.xlu0 %269  ;;  %v266_v7 = vpop.permute.xlu1 %265 }
 0x108   :  { %v347_v8 = vsel %vm325_vm9, %v268_v5, %v1821_v6  ;;  %v346_v9 = vsel %vm325_vm9, %v266_v7, %v268_v5 }
 0x109   :  { %437 = vmatprep.subr.bf16.mxu0 %v347_v8 }
 0x10a   :  { %438 = vmatpush1.bf16.msra.mxu0 %v346_v9 }
 0x10b   :  { %v280_v10 = vpop.permute.xlu0 %279  ;;  %v1826_v11 = vpop.permute.xlu1 %281 }
 0x10c   :  { %v352_v12 = vsel %vm325_vm9, %v280_v10, %v1826_v11 }
 0x10d   :  { %439 = vmatprep.subr.bf16.mxu0 %v352_v12 }
 0x10f   :  { %v278_v13 = vpop.permute.xlu0 %277  ;;  %v292_v14 = vpop.permute.xlu1 %291 }
 0x110   :  { %v351_v15 = vsel %vm325_vm9, %v278_v13, %v280_v10 }
 0x111   :  { %440 = vmatpush1.bf16.msra.mxu0 %v351_v15 }
 0x113   :  { %v1831_v16 = vpop.permute.xlu0 %293  ;;  %v290_v18 = vpop.permute.xlu1 %289 }
 0x114   :  { %v357_v19 = vsel %vm325_vm9, %v292_v14, %v1831_v16  ;;  %v356_v20 = vsel %vm325_vm9, %v290_v18, %v292_v14 }
 0x115   :  { %441 = vmatprep.subr.bf16.mxu0 %v357_v19 }
 0x116   :  { %442 = vmatpush1.bf16.msra.mxu0 %v356_v20 }
 0x117   :  { %v304_v21 = vpop.permute.xlu0 %303  ;;  %v1836_v17 = vpop.permute.xlu1 %305 }
 0x118   :  { %v362_v22 = vsel %vm325_vm9, %v304_v21, %v1836_v17 }
 0x119   :  { %443 = vmatprep.subr.bf16.mxu0 %v362_v22 }
 0x11b   :  { %v302_v23 = vpop.permute.xlu0 %301  ;;  %v224_v24 = vpop.permute.xlu1 %223 }
 0x11c   :  { %v361_v25 = vsel %vm325_vm9, %v302_v23, %v304_v21  ;;  %v328_v30 = vsel %vm325_vm9, %v1771_v28, %v224_v24 }
 0x11d   :  { %444 = vmatpush1.bf16.msra.mxu0 %v361_v25 }
 0x11f   :  { %v226_v26 = vpop.permute.xlu0 %225  ;;  %v316_v27 = vpop.permute.xlu1 %315 }
 0x120   :  { %v329_v29 = vsel %vm325_vm9, %v224_v24, %v226_v26  ;;  %v51_v24 = vld [vmem:[%s2574_s7] sm:$0x3f] }
 0x121   :  { %472 = vmatprep.subr.bf16.mxu1 %v329_v29 }
 0x122   :  { %473 = vmatpush1.bf16.msra.mxu1 %v328_v30 }
 0x123   :  { %v1844_v31 = vpop.permute.xlu0 %317  ;;  %v314_v32 = vpop.permute.xlu1 %313 }
 0x124   :  { %v367_v33 = vsel %vm325_vm9, %v316_v27, %v1844_v31  ;;  %v366_v34 = vsel %vm325_vm9, %v314_v32, %v316_v27 }
 0x125   :  { %445 = vmatprep.subr.bf16.mxu0 %v367_v33 }
 0x126   :  { %446 = vmatpush1.bf16.msra.mxu0 %v366_v34 }
 0x127   :  { %v236_v36 = vpop.permute.xlu0 %235  ;;  %v238_v37 = vpop.permute.xlu1 %237 }
 0x128   :  { %v334_v28 = vsel %vm325_vm9, %v236_v36, %v238_v37  ;;  %v333_v38 = vsel %vm325_vm9, %v1806_v54, %v236_v36 }
 0x129   :  { %474 = vmatprep.subr.bf16.mxu1 %v334_v28  ;;  %462 = vmatmul.mubr.bf16.vlgmr.msra.gmra.mrb[0].mxu0 %v1852_v35 }
 0x12a   :  { %475 = vmatpush1.bf16.msra.mxu1 %v333_v38  ;;  %1425 = vmatprep.mubr.msk.bf16.mxu0 %vm425_vm8, %v1732_v4 }
 0x12b   :  { %v228_v39 = vpop.permute.xlu0 %227  ;;  %v248_v40 = vpop.permute.xlu1 %247 }
 0x12c   :  { %515 = vmatprep.subr.bf16.mxu0 %v228_v39  ;;  %v330_v41 = vsel %vm325_vm9, %v226_v26, %v228_v39  ;;  %v338_v46 = vsel %vm325_vm9, %v1811_v59, %v248_v40 }
 0x12d   :  { %516 = vmatpush1.bf16.msra.mxu0 %v330_v41 }
 0x12f   :  { %v250_v42 = vpop.permute.xlu0 %249  ;;  %v240_v43 = vpop.permute.xlu1 %239 }
 0x130   :  { %517 = vmatprep.subr.bf16.mxu0 %v240_v43  ;;  %v339_v44 = vsel %vm325_vm9, %v248_v40, %v250_v42  ;;  %v335_v45 = vsel %vm325_vm9, %v238_v37, %v240_v43 }
 0x131   :  { %476 = vmatprep.subr.bf16.mxu1 %v339_v44  ;;  %518 = vmatpush1.bf16.msra.mxu0 %v335_v45 }
 0x132   :  { %477 = vmatpush1.bf16.msra.mxu1 %v338_v46 }
 0x133   :  { %v260_v4 = vpop.permute.xlu0 %259  ;;  %v262_v47 = vpop.permute.xlu1 %261 }
 0x134   :  { %v344_v48 = vsel %vm325_vm9, %v260_v4, %v262_v47  ;;  %v343_v49 = vsel %vm325_vm9, %v1816_v0, %v260_v4 }
 0x135   :  { %478 = vmatprep.subr.bf16.mxu1 %v344_v48 }
 0x136   :  { %479 = vmatpush1.bf16.msra.mxu1 %v343_v49 }
 0x137   :  { %v252_v50 = vpop.permute.xlu0 %251  ;;  %v272_v51 = vpop.permute.xlu1 %271 }
 0x138   :  { %519 = vmatprep.subr.bf16.mxu0 %v252_v50  ;;  %v340_v52 = vsel %vm325_vm9, %v250_v42, %v252_v50  ;;  %v348_v57 = vsel %vm325_vm9, %v1821_v6, %v272_v51 }
 0x139   :  { %520 = vmatpush1.bf16.msra.mxu0 %v340_v52 }
 0x13b   :  { %v274_v53 = vpop.permute.xlu0 %273  ;;  %v264_v54 = vpop.permute.xlu1 %263 }
 0x13c   :  { %521 = vmatprep.subr.bf16.mxu0 %v264_v54  ;;  %v349_v55 = vsel %vm325_vm9, %v272_v51, %v274_v53  ;;  %v345_v56 = vsel %vm325_vm9, %v262_v47, %v264_v54 }
 0x13d   :  { %480 = vmatprep.subr.bf16.mxu1 %v349_v55  ;;  %522 = vmatpush1.bf16.msra.mxu0 %v345_v56 }
 0x13e   :  { %481 = vmatpush1.bf16.msra.mxu1 %v348_v57 }
 0x13f   :  { %v284_v58 = vpop.permute.xlu0 %283  ;;  %v286_v59 = vpop.permute.xlu1 %285 }
 0x140   :  { %v354_v60 = vsel %vm325_vm9, %v284_v58, %v286_v59  ;;  %v353_v61 = vsel %vm325_vm9, %v1826_v11, %v284_v58 }
 0x141   :  { %482 = vmatprep.subr.bf16.mxu1 %v354_v60 }
 0x142   :  { %483 = vmatpush1.bf16.msra.mxu1 %v353_v61 }
 0x143   :  { %v276_v62 = vpop.permute.xlu0 %275  ;;  %v296_v63 = vpop.permute.xlu1 %295 }
 0x144   :  { %523 = vmatprep.subr.bf16.mxu0 %v276_v62  ;;  %v350_v0 = vsel %vm325_vm9, %v274_v53, %v276_v62  ;;  %v358_v6 = vsel %vm325_vm9, %v1831_v16, %v296_v63 }
 0x145   :  { %524 = vmatpush1.bf16.msra.mxu0 %v350_v0 }
 0x147   :  { %v298_v1 = vpop.permute.xlu0 %297  ;;  %v288_v2 = vpop.permute.xlu1 %287 }
 0x148   :  { %525 = vmatprep.subr.bf16.mxu0 %v288_v2  ;;  %v359_v5 = vsel %vm325_vm9, %v296_v63, %v298_v1  ;;  %v355_v3 = vsel %vm325_vm9, %v286_v59, %v288_v2 }
 0x149   :  { %484 = vmatprep.subr.bf16.mxu1 %v359_v5  ;;  %526 = vmatpush1.bf16.msra.mxu0 %v355_v3 }
 0x14a   :  { %485 = vmatpush1.bf16.msra.mxu1 %v358_v6 }
 0x14b   :  { %v308_v7 = vpop.permute.xlu0 %307  ;;  %v310_v8 = vpop.permute.xlu1 %309 }
 0x14c   :  { %v364_v9 = vsel %vm325_vm9, %v308_v7, %v310_v8  ;;  %v363_v10 = vsel %vm325_vm9, %v1836_v17, %v308_v7  ;;  %v563_v17 = vlaneseq }
 0x14d   :  { %486 = vmatprep.subr.bf16.mxu1 %v364_v9 }
 0x14e   :  { %487 = vmatpush1.bf16.msra.mxu1 %v363_v10  ;;  %v564_v22 = vshrl.u32 %v563_v17, 7 }
 0x14f   :  { %v300_v11 = vpop.permute.xlu0 %299  ;;  %v320_v12 = vpop.permute.xlu1 %319 }
 0x150   :  { %527 = vmatprep.subr.bf16.mxu0 %v300_v11  ;;  %v360_v13 = vsel %vm325_vm9, %v298_v1, %v300_v11  ;;  %v368_v19 = vsel %vm325_vm9, %v1844_v31, %v320_v12  ;;  %v565_v23 = vsub.s32 0, %v564_v22  ;;  %v569_v25 = vsub.s32 1, %v564_v22 }
 0x151   :  { %528 = vmatpush1.bf16.msra.mxu0 %v360_v13  ;;  %v573_v44 = vsub.s32 2, %v564_v22  ;;  %v577_v45 = vsub.s32 3, %v564_v22  ;;  %v581_v46 = vsub.s32 4, %v564_v22  ;;  %v585_v48 = vsub.s32 5, %v564_v22 }
 0x152   :  { %v1895_v26 = vrot.slane %v51_v24, %v565_v23  ;;  %v1897_v27 = vrot.slane %v51_v24, %v569_v25 }
 0x153   :  { %v322_v14 = vpop.permute.xlu0 %321  ;;  %v312_v15 = vpop.permute.xlu1 %311  ;;  %v1919_v4 = vrot.slane %v51_v24, %v573_v44  ;;  %v1921_v47 = vrot.slane %v51_v24, %v577_v45  ;;  %v1925_v50 = vrot.slane %v51_v24, %v581_v46  ;;  %v1935_v55 = vrot.slane %v51_v24, %v585_v48 }
 0x154   :  { %529 = vmatprep.subr.bf16.mxu0 %v312_v15  ;;  %v369_v16 = vsel %vm325_vm9, %v320_v12, %v322_v14  ;;  %v365_v18 = vsel %vm325_vm9, %v310_v8, %v312_v15 }
 0x155   :  { %488 = vmatprep.subr.bf16.mxu1 %v369_v16  ;;  %530 = vmatpush1.bf16.msra.mxu0 %v365_v18 }
 0x156   :  { %489 = vmatpush1.bf16.msra.mxu1 %v368_v19 }
 0x157   :  { %v324_v20 = vpop.permute.xlu0 %323 }
 0x158   :  { %531 = vmatprep.subr.bf16.mxu0 %v324_v20  ;;  %v370_v21 = vsel %vm325_vm9, %v322_v14, %v324_v20 }
 0x159   :  { %505 = vmatmul.mubr.bf16.vlgmr.msra.gmra.mrb[0].mxu1 %v1852_v35  ;;  %532 = vmatpush1.bf16.msra.mxu0 %v370_v21 }
 0x15c   :  { %548 = vmatmul.mubr.bf16.vlgmr.msra.gmra.mrb[4].mxu0 %v1852_v35 }
 0x1fc   :  { %v1899_v29 = vpop.f32.mrb[0].mxu0 }
 0x1fd   :  { %v593_v30 = vmul.f32 %v1895_v26, %v1899_v29  ;;  %v1903_v31 = vpop.f32.mrb[1].mxu0 }
 0x1fe   :  { %v594_v32 = vmul.f32 %v1897_v27, %v1903_v31  ;;  %v1907_v33 = vpop.f32.mrb[2].mxu0 }
 0x1ff   :  { %v622_v34 = vmul.f32 %v593_v30, %v1899_v29  ;;  %v599_v35 = vmul.f32 %v1895_v26, %v1907_v33  ;;  %v1912_v36 = vpop.f32.mrb[3].mxu0 }
 0x200   :  { %v605_v37 = vadd.f32 %v594_v32, %v593_v30  ;;  %v623_v28 = vmul.f32 %v594_v32, %v1903_v31  ;;  %v600_v38 = vmul.f32 %v1897_v27, %v1912_v36 }
 0x201   :  { %v628_v39 = vmul.f32 %v599_v35, %v1907_v33 }
 0x202   :  { %v634_v40 = vadd.f32 %v623_v28, %v622_v34  ;;  %v614_v41 = vadd.f32 %v600_v38, %v599_v35  ;;  %v629_v42 = vmul.f32 %v600_v38, %v1912_v36  ;;  %v1478_v38 = vmov 0  }
 0x203   :  { %742 = vst [vmem:[#allocation2 + $0x30] sm:$0xff] %v1478_v38  ;;  %1441 = vset.pattern.permute.xlu0 %v1478_v38  ;;  %1442 = vset.pattern.permute.xlu1 %v1478_v38 }
 0x204   :  { %v642_v43 = vadd.f32 %v629_v42, %v628_v39 }
 0x22c   :  { %v1923_v49 = vpop.f32.mrb[0].mxu1 }
 0x22d   :  { %v595_v51 = vmul.f32 %v1919_v4, %v1923_v49  ;;  %v1929_v52 = vpop.f32.mrb[1].mxu1 }
 0x22e   :  { %v596_v53 = vmul.f32 %v1921_v47, %v1929_v52  ;;  %v1933_v54 = vpop.f32.mrb[2].mxu1 }
 0x22f   :  { %v606_v56 = vadd.f32 %v605_v37, %v595_v51  ;;  %v624_v57 = vmul.f32 %v595_v51, %v1923_v49  ;;  %v601_v58 = vmul.f32 %v1919_v4, %v1933_v54  ;;  %v1940_v59 = vpop.f32.mrb[3].mxu1  ;;  %v1942_v60 = vpop.f32.mrb[4].mxu0 }
 0x230   :  { %v625_v61 = vmul.f32 %v596_v53, %v1929_v52  ;;  %v602_v62 = vmul.f32 %v1921_v47, %v1940_v59  ;;  %v597_v63 = vmul.f32 %v1925_v50, %v1942_v60  ;;  %v1949_v0 = vpop.f32.mrb[5].mxu0 }
 0x231   :  { %v635_v1 = vadd.f32 %v634_v40, %v624_v57  ;;  %v607_v2 = vadd.f32 %v606_v56, %v596_v53  ;;  %v615_v5 = vadd.f32 %v614_v41, %v601_v58  ;;  %v630_v3 = vmul.f32 %v601_v58, %v1933_v54  ;;  %v1952_v6 = vpop.f32.mrb[6].mxu0 }
 0x232   :  { %v631_v7 = vmul.f32 %v602_v62, %v1940_v59  ;;  %v626_v8 = vmul.f32 %v597_v63, %v1942_v60  ;;  %v598_v9 = vmul.f32 %v1935_v55, %v1949_v0  ;;  %v603_v10 = vmul.f32 %v1925_v50, %v1952_v6  ;;  %v1960_v11 = vpop.f32.mrb[7].mxu0 }
 0x233   :  { %v636_v12 = vadd.f32 %v635_v1, %v625_v61  ;;  %v643_v13 = vadd.f32 %v642_v43, %v630_v3  ;;  %v616_v14 = vadd.f32 %v615_v5, %v602_v62  ;;  %v608_v15 = vadd.f32 %v607_v2, %v597_v63  ;;  %v559_v61 = vld [vmem:[%s2575_s3 + $0x8] sm:$0xff]  ;;  %v558_v63 = vld [vmem:[%s2575_s3] sm:$0xff] }
 0x234   :  { %v627_v16 = vmul.f32 %v598_v9, %v1949_v0  ;;  %v632_v18 = vmul.f32 %v603_v10, %v1952_v6  ;;  %v604_v19 = vmul.f32 %v1935_v55, %v1960_v11  ;;  %v610_v20 = vsel %vm609_vm10, %v598_v9, 0.0  ;;  %v560_v3 = vld [vmem:[%s2576_s4] sm:$0xff] }
 0x235   :  { %v644_v21 = vadd.f32 %v643_v13, %v631_v7  ;;  %v637_v17 = vadd.f32 %v636_v12, %v626_v8  ;;  %v617_v22 = vadd.f32 %v616_v14, %v603_v10  ;;  %v611_v23 = vadd.f32 %v610_v20, %v608_v15  ;;  %v561_v10 = vld [vmem:[%s2576_s4 + $0x8] sm:$0xff] }
 0x236   :  { %v633_v24 = vmul.f32 %v604_v19, %v1960_v11  ;;  %v618_v25 = vsel %vm609_vm10, %v604_v19, 0.0  ;;  %v638_v30 = vsel %vm609_vm10, %v627_v16, 0.0 }
 0x237   :  { %v645_v32 = vadd.f32 %v644_v21, %v632_v18  ;;  %612 = vadd.xlane.f32.xlu1 %v611_v23  ;;  %v619_v34 = vadd.f32 %v618_v25, %v617_v22  ;;  %v639_v35 = vadd.f32 %v638_v30, %v637_v17 }
 0x238   :  { %v646_v37 = vsel %vm609_vm10, %v633_v24, 0.0 }
 0x239   :  { %620 = vadd.xlane.f32.xlu0 %v619_v34  ;;  %v647_v28 = vadd.f32 %v646_v37, %v645_v32 }
 0x23b   :  { %648 = vadd.xlane.f32.xlu1 %v647_v28 }
 0x23d   :  { %640 = vadd.xlane.f32.xlu0 %v639_v35 }
 0x24c   :  { %771 = vrot.lane.b32.xlu1 %v1478_v38, %s1469_s21 }
 0x250   :  { %920 = vrot.lane.b32.xlu1 %v1478_v38, %s1477_s19 }
 0x2c4   :  { %v613_v39 = vpop.xlane.xlu1 %612 }
 0x2c5   :  { %v650_v41 = vmul.f32 0.001953125, %v613_v39 }
 0x2c6   :  { %v621_v40 = vpop.xlane.xlu0 %620 }
 0x2c7   :  { %v651_v42 = vmul.f32 0.001953125, %v621_v40  ;;  %v654_v48 = vmul.f32 %v650_v41, %v650_v41 }
 0x2c8   :  { %v649_v43 = vpop.xlane.xlu1 %648 }
 0x2c9   :  { %v655_v44 = vmul.f32 %v651_v42, %v651_v42  ;;  %v653_v45 = vmul.f32 0.001953125, %v649_v43 }
 0x2ca   :  { %v641_v46 = vpop.xlane.xlu0 %640 }
 0x2cb   :  { %v657_v51 = vsub.f32 %v653_v45, %v655_v44  ;;  %v652_v53 = vmul.f32 0.001953125, %v641_v46 }
 0x2cc   :  { %v1987_v13 = vpop.permute.xlu1 %771 }
 0x2cd   :  { %v659_v56 = vadd.f32 1e-05, %v657_v51  ;;  %v656_v57 = vsub.f32 %v652_v53, %v654_v48 }
 0x2cf   :  { %1449 = vrsqrt.f32 %v659_v56  ;;  %v658_v58 = vadd.f32 1e-05, %v656_v57 }
 0x2d0   :  { %v1989_v14 = vpop.permute.xlu1 %920 }
 0x2d1   :  { %1451 = vrsqrt.f32 %v658_v58 }
 0x2d9   :  { %v1450_v62 = vpop.eup %1449 }
 0x2da   :  { %v663_v1 = vmul.f32 %v1450_v62, %v559_v61 }
 0x2db   :  { %v1452_v2 = vpop.eup %1451 }
 0x2dc   :  { %675 = vperm.xlu1 %1442, %v663_v1   ;;  %v662_v5 = vmul.f32 %v1452_v2, %v558_v63  ;;  %v665_v9 = vmul.f32 %v663_v1, %v651_v42 }
 0x2de   :  { %670 = vperm.xlu0 %1441, %v662_v5   ;;  %v664_v7 = vmul.f32 %v662_v5, %v650_v41  ;;  %v667_v12 = vsub.f32 %v561_v10, %v665_v9 }
 0x2e0   :  { %v666_v8 = vsub.f32 %v560_v3, %v664_v7 }
 0x2e2   :  { %692 = vperm.xlu1 %1442, %v666_v8   ;;  %788 = vrot.lane.b32.xlu0 %v1478_v38, %s1470_s22 }
 0x2e6   :  { %697 = vperm.xlu1 %1442, %v667_v12   ;;  %806 = vrot.lane.b32.xlu0 %v1478_v38, %s1471_s23 }
 0x35b   :  { %v676_v15 = vpop.permute.xlu1 %675 }
 0x35c   :  { %v684_v37 = vmul.f32 %v676_v15, %v1907_v33  ;;  %v688_v39 = vmul.f32 %v676_v15, %v1952_v6  ;;  %v689_v40 = vmul.f32 %v676_v15, %v1960_v11 }
 0x35d   :  { %v671_v16 = vpop.permute.xlu0 %670 }
 0x35e   :  { %v678_v18 = vmul.f32 %v671_v16, %v1899_v29  ;;  %v679_v19 = vmul.f32 %v671_v16, %v1903_v31  ;;  %v680_v20 = vmul.f32 %v671_v16, %v1923_v49  ;;  %v681_v21 = vmul.f32 %v671_v16, %v1929_v52 }
 0x35f   :  { %v682_v17 = vmul.f32 %v671_v16, %v1942_v60  ;;  %v683_v22 = vmul.f32 %v671_v16, %v1949_v0  ;;  %v685_v29 = vmul.f32 %v676_v15, %v1912_v36  ;;  %v686_v49 = vmul.f32 %v676_v15, %v1933_v54 }
 0x360   :  { %v687_v52 = vmul.f32 %v676_v15, %v1940_v59 }
 0x361   :  { %v693_v23 = vpop.permute.xlu1 %692 }
 0x362   :  { %v700_v24 = vadd.f32 %v693_v23, %v678_v18  ;;  %v701_v25 = vadd.f32 %v693_v23, %v679_v19  ;;  %v702_v30 = vadd.f32 %v693_v23, %v680_v20  ;;  %v703_v32 = vadd.f32 %v693_v23, %v681_v21  ;;  %v2066_v19 = vpop.permute.xlu0 %788 }
 0x363   :  { %v704_v34 = vadd.f32 %v693_v23, %v682_v17  ;;  %v705_v35 = vadd.f32 %v693_v23, %v683_v22 }
 0x364   :  { %v712_v31 = vmax.f32 %v700_v24, 0.0  ;;  %v713_v28 = vmax.f32 %v701_v25, 0.0  ;;  %v714_v60 = vmax.f32 %v702_v30, 0.0  ;;  %v715_v38 = vmax.f32 %v703_v32, 0.0 }
 0x365   :  { %v698_v0 = vpop.permute.xlu1 %697  ;;  %v716_v41 = vmax.f32 %v704_v34, 0.0  ;;  %v717_v42 = vmax.f32 %v705_v35, 0.0 }
 0x366   :  { %v724_v43 = vmul.f32 %v712_v31, %v1895_v26  ;;  %v725_v33 = vmul.f32 %v713_v28, %v1897_v27  ;;  %v706_v36 = vadd.f32 %v698_v0, %v684_v37  ;;  %v707_v44 = vadd.f32 %v698_v0, %v685_v29  ;;  %v2069_v20 = vpop.permute.xlu0 %806 }
 0x367   :  { %v708_v45 = vadd.f32 %v698_v0, %v686_v49  ;;  %v709_v46 = vadd.f32 %v698_v0, %v687_v52  ;;  %v710_v54 = vadd.f32 %v698_v0, %v688_v39  ;;  %v711_v48 = vadd.f32 %v698_v0, %v689_v40 }
 0x368   :  { %v726_v59 = vmul.f32 %v714_v60, %v1919_v4  ;;  %v727_v51 = vmul.f32 %v715_v38, %v1921_v47  ;;  %v718_v53 = vmax.f32 %v706_v36, 0.0  ;;  %v719_v6 = vmax.f32 %v707_v44, 0.0 }
 0x369   :  { %v720_v56 = vmax.f32 %v708_v45, 0.0  ;;  %v721_v11 = vmax.f32 %v709_v46, 0.0  ;;  %v722_v57 = vmax.f32 %v710_v54, 0.0  ;;  %v723_v58 = vmax.f32 %v711_v48, 0.0 }
 0x36a   :  { %v728_v61 = vmul.f32 %v716_v41, %v1925_v50  ;;  %v729_v62 = vmul.f32 %v717_v42, %v1935_v55  ;;  %v730_v63 = vmul.f32 %v718_v53, %v1895_v26  ;;  %v731_v1 = vmul.f32 %v719_v6, %v1897_v27 }
 0x36b   :  { %v732_v2 = vmul.f32 %v720_v56, %v1919_v4  ;;  %v733_v5 = vmul.f32 %v721_v11, %v1921_v47  ;;  %v734_v3 = vmul.f32 %v722_v57, %v1925_v50  ;;  %v735_v7 = vmul.f32 %v723_v58, %v1935_v55 }
 0x36c   :  { %v744_v8 = vpack.c.bf16 %v730_v63, %v724_v43  ;;  %v745_v9 = vpack.c.bf16 %v731_v1, %v725_v33 }
 0x36d   :  { %v746_v10 = vpack.c.bf16 %v732_v2, %v726_v59  ;;  %v747_v12 = vpack.c.bf16 %v733_v5, %v727_v51  ;;  %v748_v15 = vpack.c.bf16 %v734_v3, %v728_v61  ;;  %v749_v16 = vpack.c.bf16 %v735_v7, %v729_v62 }
 0x36e   :  { %792 = vrot.lane.b32.xlu0 %v745_v9, %s1470_s22  ;;  %773 = vrot.lane.b32.xlu1 %v744_v8, %s1469_s21 }
 0x36f   :  { %755 = vst.msk [vmem:[#allocation2 + $0x30] sm:$0xff] %vm609_vm10, %v749_v16 }
 0x372   :  { %810 = vrot.lane.b32.xlu0 %v745_v9, %s1471_s23  ;;  %775 = vrot.lane.b32.xlu1 %v745_v9, %s1469_s21 }
 0x376   :  { %828 = vrot.lane.b32.xlu0 %v745_v9, %s1472_s24  ;;  %777 = vrot.lane.b32.xlu1 %v746_v10, %s1469_s21  ;;  %v764_v18 = vld [vmem:[#allocation2 + $0x30] sm:$0xff] }
 0x37a   :  { %843 = vrot.lane.b32.xlu0 %v744_v8, %s1473_s25  ;;  %790 = vrot.lane.b32.xlu1 %v744_v8, %s1470_s22 }
 0x37e   :  { %847 = vrot.lane.b32.xlu0 %v746_v10, %s1473_s25  ;;  %794 = vrot.lane.b32.xlu1 %v746_v10, %s1470_s22 }
 0x382   :  { %862 = vrot.lane.b32.xlu0 %v745_v9, %s1474_s26  ;;  %808 = vrot.lane.b32.xlu1 %v744_v8, %s1471_s23 }
 0x386   :  { %877 = vrot.lane.b32.xlu0 %v744_v8, %s1475_s27  ;;  %812 = vrot.lane.b32.xlu1 %v746_v10, %s1471_s23 }
 0x38a   :  { %881 = vrot.lane.b32.xlu0 %v746_v10, %s1475_s27  ;;  %826 = vrot.lane.b32.xlu1 %v744_v8, %s1472_s24 }
 0x38e   :  { %896 = vrot.lane.b32.xlu0 %v745_v9, %s1476_s10  ;;  %830 = vrot.lane.b32.xlu1 %v746_v10, %s1472_s24 }
 0x392   :  { %779 = vrot.lane.b32.xlu0 %v747_v12, %s1469_s21  ;;  %845 = vrot.lane.b32.xlu1 %v745_v9, %s1473_s25 }
 0x396   :  { %796 = vrot.lane.b32.xlu0 %v747_v12, %s1470_s22  ;;  %860 = vrot.lane.b32.xlu1 %v744_v8, %s1474_s26 }
 0x39a   :  { %814 = vrot.lane.b32.xlu0 %v747_v12, %s1471_s23  ;;  %864 = vrot.lane.b32.xlu1 %v746_v10, %s1474_s26 }
 0x39e   :  { %832 = vrot.lane.b32.xlu0 %v747_v12, %s1472_s24  ;;  %879 = vrot.lane.b32.xlu1 %v745_v9, %s1475_s27 }
 0x3a2   :  { %818 = vrot.lane.b32.xlu0 %v764_v18, %s1471_s23  ;;  %894 = vrot.lane.b32.xlu1 %v744_v8, %s1476_s10 }
 0x3a6   :  { %851 = vrot.lane.b32.xlu0 %v748_v15, %s1473_s25  ;;  %898 = vrot.lane.b32.xlu1 %v746_v10, %s1476_s10 }
 0x3aa   :  { %866 = vrot.lane.b32.xlu0 %v747_v12, %s1474_s26  ;;  %781 = vrot.lane.b32.xlu1 %v748_v15, %s1469_s21 }
 0x3ae   :  { %853 = vrot.lane.b32.xlu0 %v764_v18, %s1473_s25  ;;  %798 = vrot.lane.b32.xlu1 %v748_v15, %s1470_s22 }
 0x3b2   :  { %924 = vrot.lane.b32.xlu0 %v745_v9, %s1477_s19  ;;  %816 = vrot.lane.b32.xlu1 %v748_v15, %s1471_s23 }
 0x3b6   :  { %885 = vrot.lane.b32.xlu0 %v748_v15, %s1475_s27  ;;  %834 = vrot.lane.b32.xlu1 %v748_v15, %s1472_s24 }
 0x3ba   :  { %870 = vrot.lane.b32.xlu0 %v764_v18, %s1474_s26  ;;  %849 = vrot.lane.b32.xlu1 %v747_v12, %s1473_s25 }
 0x3be   :  { %902 = vrot.lane.b32.xlu0 %v748_v15, %s1476_s10  ;;  %836 = vrot.lane.b32.xlu1 %v764_v18, %s1472_s24 }
 0x3c2   :  { %887 = vrot.lane.b32.xlu0 %v764_v18, %s1475_s27  ;;  %868 = vrot.lane.b32.xlu1 %v748_v15, %s1474_s26 }
 0x3c6   :  { %904 = vrot.lane.b32.xlu0 %v764_v18, %s1476_s10  ;;  %922 = vrot.lane.b32.xlu1 %v744_v8, %s1477_s19 }
 0x3ca   :  { %926 = vrot.lane.b32.xlu0 %v746_v10, %s1477_s19  ;;  %883 = vrot.lane.b32.xlu1 %v747_v12, %s1475_s27 }
 0x3ce   :  { %900 = vrot.lane.b32.xlu1 %v747_v12, %s1476_s10 }
 0x3d2   :  { %928 = vrot.lane.b32.xlu1 %v747_v12, %s1477_s19 }
 0x3d6   :  { %930 = vrot.lane.b32.xlu1 %v748_v15, %s1477_s19 }
 0x3e0   :  { %v793_v21 = vpop.permute.xlu0 %792  ;;  %v774_v17 = vpop.permute.xlu1 %773 }
 0x3e1   :  { %v783_v1 = vsel %vm72_vm0, %v1987_v13, %v774_v17 }
 0x3e4   :  { %v2071_v22 = vpop.permute.xlu0 %810  ;;  %v776_v23 = vpop.permute.xlu1 %775 }
 0x3e5   :  { %v784_v58 = vsel %vm72_vm0, %v774_v17, %v776_v23 }
 0x3e8   :  { %v2073_v24 = vpop.permute.xlu0 %828  ;;  %v2075_v25 = vpop.permute.xlu1 %777 }
 0x3e9   :  { %v785_v6 = vsel %vm72_vm0, %v776_v23, %v2075_v25 }
 0x3ec   :  { %v2077_v30 = vpop.permute.xlu0 %843  ;;  %v791_v32 = vpop.permute.xlu1 %790 }
 0x3ed   :  { %980 = vrot.lane.b32.xlu1 %v2077_v30, %s1477_s19  ;;  %v801_v7 = vsel %vm90_vm1, %v791_v32, %v793_v21  ;;  %v800_v9 = vsel %vm90_vm1, %v2066_v19, %v791_v32 }
 0x3f0   :  { %v2081_v34 = vpop.permute.xlu0 %847  ;;  %v2083_v35 = vpop.permute.xlu1 %794 }
 0x3f1   :  { %v802_v57 = vsel %vm90_vm1, %v793_v21, %v2083_v35 }
 0x3f4   :  { %v2085_v37 = vpop.permute.xlu0 %862  ;;  %v2087_v29 = vpop.permute.xlu1 %808 }
 0x3f5   :  { %v821_v16 = vsel %vm111_vm2, %v2087_v29, %v2071_v22  ;;  %v820_v17 = vsel %vm111_vm2, %v2069_v20, %v2087_v29 }
 0x3f8   :  { %v2089_v31 = vpop.permute.xlu0 %877  ;;  %v2091_v28 = vpop.permute.xlu1 %812 }
 0x3f9   :  { %1004 = vrot.lane.b32.xlu1 %v2089_v31, %s1477_s19  ;;  %v822_v63 = vsel %vm111_vm2, %v2071_v22, %v2091_v28 }
 0x3fc   :  { %v2095_v49 = vpop.permute.xlu0 %881  ;;  %v827_v52 = vpop.permute.xlu1 %826 }
 0x3fd   :  { %968 = vrot.lane.b32.xlu0 %v827_v52, %s1477_s19  ;;  %v838_v2 = vsel %vm130_vm3, %v827_v52, %v2073_v24 }
 0x400   :  { %v2098_v60 = vpop.permute.xlu0 %896  ;;  %v2100_v38 = vpop.permute.xlu1 %830 }
 0x401   :  { %v839_v32 = vsel %vm130_vm3, %v2073_v24, %v2100_v38 }
 0x404   :  { %v2102_v0 = vpop.permute.xlu0 %779  ;;  %v2104_v39 = vpop.permute.xlu1 %845 }
 0x405   :  { %v856_v13 = vsel %vm148_vm4, %v2104_v39, %v2081_v34 }
 0x408   :  { %v2106_v40 = vpop.permute.xlu0 %796  ;;  %v861_v41 = vpop.permute.xlu1 %860 }
 0x409   :  { %992 = vrot.lane.b32.xlu0 %v861_v41, %s1477_s19  ;;  %v872_v12 = vsel %vm166_vm5, %v861_v41, %v2085_v37 }
 0x40c   :  { %v2109_v42 = vpop.permute.xlu0 %814  ;;  %v2111_v43 = vpop.permute.xlu1 %864 }
 0x410   :  { %v2113_v33 = vpop.permute.xlu0 %832  ;;  %v2115_v36 = vpop.permute.xlu1 %879 }
 0x411   :  { %v890_v19 = vsel %vm184_vm6, %v2115_v36, %v2095_v49 }
 0x414   :  { %v2117_v44 = vpop.permute.xlu0 %818  ;;  %v895_v45 = vpop.permute.xlu1 %894 }
 0x415   :  { %1016 = vrot.lane.b32.xlu0 %v895_v45, %s1477_s19  ;;  %v906_v52 = vsel %vm202_vm7, %v895_v45, %v2098_v60  ;;  %v803_v45 = vsel %vm90_vm1, %v2083_v35, %v2106_v40 }
 0x418   :  { %v2120_v46 = vpop.permute.xlu0 %851  ;;  %v2122_v54 = vpop.permute.xlu1 %898 }
 0x41c   :  { %v2124_v48 = vpop.permute.xlu0 %866  ;;  %v782_v59 = vpop.permute.xlu1 %781 }
 0x41d   :  { %942 = vrot.lane.b32.xlu0 %v782_v59, %s1477_s19  ;;  %v787_v29 = vsel %vm72_vm0, %v2102_v0, %v782_v59 }
 0x420   :  { %v2127_v51 = vpop.permute.xlu0 %853  ;;  %v2129_v53 = vpop.permute.xlu1 %798 }
 0x421   :  { %936 = vrot.lane.b32.xlu0 %v785_v6, %s1477_s19  ;;  %954 = vrot.lane.b32.xlu1 %v2129_v53, %s1477_s19 }
 0x424   :  { %v925_v56 = vpop.permute.xlu0 %924  ;;  %v2136_v11 = vpop.permute.xlu1 %816 }
 0x425   :  { %948 = vrot.lane.b32.xlu0 %v802_v57, %s1477_s19  ;;  %934 = vrot.lane.b32.xlu1 %v784_v58, %s1477_s19  ;;  %v873_v57 = vsel %vm166_vm5, %v2085_v37, %v2111_v43  ;;  %v889_v37 = vsel %vm184_vm6, %v2089_v31, %v2115_v36  ;;  %v824_v59 = vsel %vm111_vm2, %v2109_v42, %v2136_v11 }
 0x426   :  { %v786_v31 = vsel %vm72_vm0, %v2075_v25, %v2102_v0  ;;  %v825_v36 = vsel %vm111_vm2, %v2136_v11, %v2117_v44  ;;  %v823_v25 = vsel %vm111_vm2, %v2091_v28, %v2109_v42  ;;  %v874_v0 = vsel %vm166_vm5, %v2111_v43, %v2124_v48 }
 0x428   :  { %v2143_v61 = vpop.permute.xlu0 %885  ;;  %v2145_v62 = vpop.permute.xlu1 %834 }
 0x429   :  { %960 = vrot.lane.b32.xlu0 %v822_v63, %s1477_s19  ;;  %932 = vrot.lane.b32.xlu1 %v783_v1, %s1477_s19  ;;  %v907_v63 = vsel %vm202_vm7, %v2098_v60, %v2122_v54  ;;  %v804_v60 = vsel %vm90_vm1, %v2106_v40, %v2129_v53  ;;  %v859_v40 = vsel %vm148_vm4, %v2120_v46, %v2127_v51 }
 0x42a   :  { %v841_v44 = vsel %vm130_vm3, %v2113_v33, %v2145_v62 }
 0x42c   :  { %v2156_v5 = vpop.permute.xlu0 %870  ;;  %v2158_v3 = vpop.permute.xlu1 %849 }
 0x42d   :  { %970 = vrot.lane.b32.xlu0 %v838_v2, %s1477_s19  ;;  %946 = vrot.lane.b32.xlu1 %v801_v7, %s1477_s19  ;;  %v857_v28 = vsel %vm148_vm4, %v2081_v34, %v2158_v3 }
 0x430   :  { %v2166_v8 = vpop.permute.xlu1 %836  ;;  %v2170_v10 = vpop.permute.xlu0 %902 }
 0x431   :  { %984 = vrot.lane.b32.xlu0 %v856_v13, %s1477_s19  ;;  %944 = vrot.lane.b32.xlu1 %v800_v9, %s1477_s19  ;;  %v842_v43 = vsel %vm130_vm3, %v2145_v62, %v2166_v8 }
 0x434   :  { %v2176_v15 = vpop.permute.xlu1 %868  ;;  %v2183_v18 = vpop.permute.xlu0 %887 }
 0x435   :  { %994 = vrot.lane.b32.xlu0 %v872_v12, %s1477_s19  ;;  %958 = vrot.lane.b32.xlu1 %v821_v16, %s1477_s19  ;;  %v893_v34 = vsel %vm184_vm6, %v2143_v61, %v2183_v18 }
 0x438   :  { %v923_v21 = vpop.permute.xlu1 %922  ;;  %v2201_v20 = vpop.permute.xlu0 %904 }
 0x439   :  { %v1028_v23 = vsel %vm325_vm9, %v1989_v14, %v923_v21  ;;  %1008 = vrot.lane.b32.xlu0 %v890_v19, %s1477_s19  ;;  %956 = vrot.lane.b32.xlu1 %v820_v17, %s1477_s19  ;;  %v1029_v22 = vsel %vm325_vm9, %v923_v21, %v925_v56  ;;  %v855_v14 = vsel %vm148_vm4, %v2077_v30, %v2104_v39  ;;  %v2223_v30 = vld [vmem:[%s2577_s2 + $0x4] ss:$8 sps:$4 sm:$0xff]  }
 0x43a   :  { %1130 = vmatprep.subr.bf16.mxu1 %v1029_v22  ;;  %1428 = vmatprep.mubr.msk.bf16.mxu1 %vm425_vm8, %v2223_v30 }
 0x43b   :  { %1131 = vmatpush1.bf16.msra.mxu1 %v1028_v23  ;;  %1429 = vmatprep.mubr.msk.bf16.mxu0 %vm425_vm8, %v2223_v30 }
 0x43c   :  { %v884_v41 = vpop.permute.xlu1 %883  ;;  %v927_v24 = vpop.permute.xlu0 %926 }
 0x43d   :  { %1018 = vrot.lane.b32.xlu0 %v906_v52, %s1477_s19  ;;  %972 = vrot.lane.b32.xlu1 %v839_v32, %s1477_s19  ;;  %v1030_v35 = vsel %vm325_vm9, %v925_v56, %v927_v24  ;;  %v840_v56 = vsel %vm130_vm3, %v2100_v38, %v2113_v33  ;;  %v858_v38 = vsel %vm148_vm4, %v2158_v3, %v2120_v46 }
 0x43e   :  { %v892_v42 = vsel %vm184_vm6, %v884_v41, %v2143_v61  ;;  %v875_v46 = vsel %vm166_vm5, %v2124_v48, %v2176_v15  ;;  %v891_v51 = vsel %vm184_vm6, %v2095_v49, %v884_v41  ;;  %v910_v48 = vsel %vm202_vm7, %v2170_v10, %v2201_v20 }
 0x440   :  { %v901_v6 = vpop.permute.xlu1 %900 }
 0x441   :  { %940 = vrot.lane.b32.xlu0 %v787_v29, %s1477_s19  ;;  %982 = vrot.lane.b32.xlu1 %v855_v14, %s1477_s19  ;;  %v908_v33 = vsel %vm202_vm7, %v2122_v54, %v901_v6  ;;  %v876_v54 = vsel %vm166_vm5, %v2176_v15, %v2156_v5  ;;  %v909_v53 = vsel %vm202_vm7, %v901_v6, %v2170_v10 }
 0x444   :  { %v2218_v58 = vpop.permute.xlu1 %928 }
 0x445   :  { %950 = vrot.lane.b32.xlu0 %v803_v45, %s1477_s19  ;;  %996 = vrot.lane.b32.xlu1 %v873_v57, %s1477_s19  ;;  %v1031_v39 = vsel %vm325_vm9, %v927_v24, %v2218_v58 }
 0x446   :  { %1173 = vmatprep.subr.bf16.mxu0 %v1031_v39 }
 0x447   :  { %1174 = vmatpush1.bf16.msra.mxu0 %v1030_v35 }
 0x448   :  { %v2318_v11 = vpop.permute.xlu1 %930 }
 0x449   :  { %1006 = vrot.lane.b32.xlu1 %v889_v37, %s1477_s19  ;;  %964 = vrot.lane.b32.xlu0 %v824_v59, %s1477_s19 }
 0x44d   :  { %1020 = vrot.lane.b32.xlu1 %v907_v63, %s1477_s19  ;;  %974 = vrot.lane.b32.xlu0 %v840_v56, %s1477_s19 }
 0x451   :  { %938 = vrot.lane.b32.xlu1 %v786_v31, %s1477_s19  ;;  %966 = vrot.lane.b32.xlu0 %v825_v36, %s1477_s19 }
 0x455   :  { %952 = vrot.lane.b32.xlu1 %v804_v60, %s1477_s19  ;;  %988 = vrot.lane.b32.xlu0 %v858_v38, %s1477_s19 }
 0x459   :  { %962 = vrot.lane.b32.xlu1 %v823_v25, %s1477_s19  ;;  %998 = vrot.lane.b32.xlu0 %v874_v0, %s1477_s19 }
 0x45d   :  { %976 = vrot.lane.b32.xlu1 %v841_v44, %s1477_s19  ;;  %990 = vrot.lane.b32.xlu0 %v859_v40, %s1477_s19 }
 0x45f   :  { %v981_v62 = vpop.permute.xlu1 %980 }
 0x461   :  { %986 = vrot.lane.b32.xlu1 %v857_v28, %s1477_s19  ;;  %1012 = vrot.lane.b32.xlu0 %v892_v42, %s1477_s19  ;;  %v2364_v42 = vld [vmem:[%s2577_s2] ss:$8 sps:$4 sm:$0xff]  }
 0x465   :  { %978 = vrot.lane.b32.xlu1 %v842_v43, %s1477_s19  ;;  %1022 = vrot.lane.b32.xlu0 %v908_v33, %s1477_s19 }
 0x469   :  { %1000 = vrot.lane.b32.xlu1 %v875_v46, %s1477_s19  ;;  %1014 = vrot.lane.b32.xlu0 %v893_v34, %s1477_s19 }
 0x46b   :  { %v1005_v2 = vpop.permute.xlu1 %1004 }
 0x46d   :  { %1010 = vrot.lane.b32.xlu1 %v891_v51, %s1477_s19  ;;  %v1032_v51 = vsel %vm325_vm9, %v2218_v58, %v2318_v11 }
 0x46f   :  { %v969_v49 = vpop.permute.xlu0 %968 }
 0x471   :  { %1002 = vrot.lane.b32.xlu1 %v876_v54, %s1477_s19 }
 0x475   :  { %1024 = vrot.lane.b32.xlu1 %v909_v53, %s1477_s19 }
 0x479   :  { %1026 = vrot.lane.b32.xlu1 %v910_v48, %s1477_s19 }
 0x47b   :  { %v993_v61 = vpop.permute.xlu0 %992 }
 0x487   :  { %v1017_v1 = vpop.permute.xlu0 %1016 }
 0x48f   :  { %v2320_v5 = vpop.permute.xlu0 %942 }
 0x493   :  { %v937_v3 = vpop.permute.xlu0 %936  ;;  %v2322_v7 = vpop.permute.xlu1 %954 }
 0x497   :  { %v2324_v13 = vpop.permute.xlu0 %948  ;;  %v935_v8 = vpop.permute.xlu1 %934 }
 0x498   :  { %v1034_v9 = vsel %vm325_vm9, %v935_v8, %v937_v3 }
 0x499   :  { %1132 = vmatprep.subr.bf16.mxu1 %v1034_v9 }
 0x49b   :  { %v2327_v10 = vpop.permute.xlu0 %960  ;;  %v933_v12 = vpop.permute.xlu1 %932 }
 0x49c   :  { %v1033_v15 = vsel %vm325_vm9, %v933_v12, %v935_v8 }
 0x49d   :  { %1133 = vmatpush1.bf16.msra.mxu1 %v1033_v15 }
 0x49f   :  { %v971_v16 = vpop.permute.xlu0 %970  ;;  %v947_v18 = vpop.permute.xlu1 %946 }
 0x4a0   :  { %v1039_v19 = vsel %vm325_vm9, %v947_v18, %v2324_v13  ;;  %v1048_v45 = vsel %vm325_vm9, %v969_v49, %v971_v16 }
 0x4a1   :  { %1134 = vmatprep.subr.bf16.mxu1 %v1039_v19 }
 0x4a3   :  { %v2332_v21 = vpop.permute.xlu0 %984  ;;  %v945_v17 = vpop.permute.xlu1 %944 }
 0x4a4   :  { %v1038_v23 = vsel %vm325_vm9, %v945_v17, %v947_v18 }
 0x4a5   :  { %1135 = vmatpush1.bf16.msra.mxu1 %v1038_v23 }
 0x4a7   :  { %v995_v22 = vpop.permute.xlu0 %994  ;;  %v959_v32 = vpop.permute.xlu1 %958 }
 0x4a8   :  { %v1044_v52 = vsel %vm325_vm9, %v959_v32, %v2327_v10  ;;  %v1058_v31 = vsel %vm325_vm9, %v993_v61, %v995_v22 }
 0x4a9   :  { %1136 = vmatprep.subr.bf16.mxu1 %v1044_v52 }
 0x4ab   :  { %v2337_v41 = vpop.permute.xlu0 %1008  ;;  %v957_v20 = vpop.permute.xlu1 %956 }
 0x4ac   :  { %v1043_v14 = vsel %vm325_vm9, %v957_v20, %v959_v32 }
 0x4ad   :  { %1137 = vmatpush1.bf16.msra.mxu1 %v1043_v14 }
 0x4af   :  { %v1019_v29 = vpop.permute.xlu0 %1018  ;;  %v2340_v6 = vpop.permute.xlu1 %972 }
 0x4b0   :  { %v1049_v24 = vsel %vm325_vm9, %v971_v16, %v2340_v6  ;;  %v1068_v28 = vsel %vm325_vm9, %v1017_v1, %v1019_v29 }
 0x4b1   :  { %1138 = vmatprep.subr.bf16.mxu1 %v1049_v24 }
 0x4b2   :  { %1139 = vmatpush1.bf16.msra.mxu1 %v1048_v45 }
 0x4b3   :  { %v941_v57 = vpop.permute.xlu0 %940  ;;  %v983_v39 = vpop.permute.xlu1 %982 }
 0x4b4   :  { %v1053_v35 = vsel %vm325_vm9, %v981_v62, %v983_v39  ;;  %v1054_v37 = vsel %vm325_vm9, %v983_v39, %v2332_v21  ;;  %v1037_v49 = vsel %vm325_vm9, %v941_v57, %v2320_v5 }
 0x4b5   :  { %1140 = vmatprep.subr.bf16.mxu1 %v1054_v37 }
 0x4b6   :  { %1141 = vmatpush1.bf16.msra.mxu1 %v1053_v35 }
 0x4b7   :  { %v951_v59 = vpop.permute.xlu0 %950  ;;  %v2348_v56 = vpop.permute.xlu1 %996 }
 0x4b8   :  { %v1059_v63 = vsel %vm325_vm9, %v995_v22, %v2348_v56  ;;  %v1040_v58 = vsel %vm325_vm9, %v2324_v13, %v951_v59 }
 0x4b9   :  { %1142 = vmatprep.subr.bf16.mxu1 %v1059_v63 }
 0x4ba   :  { %1143 = vmatpush1.bf16.msra.mxu1 %v1058_v31 }
 0x4bb   :  { %v965_v36 = vpop.permute.xlu0 %964  ;;  %v1007_v60 = vpop.permute.xlu1 %1006 }
 0x4bc   :  { %v1063_v38 = vsel %vm325_vm9, %v1005_v2, %v1007_v60  ;;  %v1064_v25 = vsel %vm325_vm9, %v1007_v60, %v2337_v41 }
 0x4bd   :  { %1144 = vmatprep.subr.bf16.mxu1 %v1064_v25 }
 0x4be   :  { %1145 = vmatpush1.bf16.msra.mxu1 %v1063_v38 }
 0x4bf   :  { %v975_v0 = vpop.permute.xlu0 %974  ;;  %v2356_v40 = vpop.permute.xlu1 %1020 }
 0x4c0   :  { %v1069_v44 = vsel %vm325_vm9, %v1019_v29, %v2356_v40 }
 0x4c1   :  { %1146 = vmatprep.subr.bf16.mxu1 %v1069_v44 }
 0x4c2   :  { %1147 = vmatpush1.bf16.msra.mxu1 %v1068_v28 }
 0x4c3   :  { %v967_v43 = vpop.permute.xlu0 %966  ;;  %1216 = vmatprep.subr.bf16.mxu1 %v2318_v11  ;;  %v939_v33 = vpop.permute.xlu1 %938 }
 0x4c4   :  { %v1035_v34 = vsel %vm325_vm9, %v937_v3, %v939_v33  ;;  %v1036_v46 = vsel %vm325_vm9, %v939_v33, %v941_v57  ;;  %v1050_v3 = vsel %vm325_vm9, %v2340_v6, %v975_v0  ;;  %v1047_v13 = vsel %vm325_vm9, %v965_v36, %v967_v43 }
 0x4c5   :  { %1175 = vmatprep.subr.bf16.mxu0 %v1036_v46  ;;  %1163 = vmatmul.mubr.bf16.vlgmr.msra.gmra.mrb[4].mxu1 %v2364_v42 }
 0x4c6   :  { %1176 = vmatpush1.bf16.msra.mxu0 %v1035_v34  ;;  %1217 = vmatpush1.bf16.msra.mxu1 %v1032_v51 }
 0x4c7   :  { %v989_v54 = vpop.permute.xlu0 %988  ;;  %1218 = vmatprep.subr.bf16.mxu1 %v2320_v5  ;;  %v953_v53 = vpop.permute.xlu1 %952  ;;  %1430 = vmatprep.mubr.msk.bf16.mxu1 %vm425_vm8, %v2223_v30 }
 0x4c8   :  { %v1041_v48 = vsel %vm325_vm9, %v951_v59, %v953_v53  ;;  %v1042_v30 = vsel %vm325_vm9, %v953_v53, %v2322_v7 }
 0x4c9   :  { %1177 = vmatprep.subr.bf16.mxu0 %v1041_v48 }
 0x4ca   :  { %1178 = vmatpush1.bf16.msra.mxu0 %v1040_v58  ;;  %1219 = vmatpush1.bf16.msra.mxu1 %v1037_v49 }
 0x4cb   :  { %1220 = vmatprep.subr.bf16.mxu1 %v2322_v7  ;;  %v963_v11 = vpop.permute.xlu1 %962  ;;  %v999_v1 = vpop.permute.xlu0 %998 }
 0x4cc   :  { %v1045_v61 = vsel %vm325_vm9, %v2327_v10, %v963_v11  ;;  %v1046_v62 = vsel %vm325_vm9, %v963_v11, %v965_v36  ;;  %v1060_v23 = vsel %vm325_vm9, %v2348_v56, %v999_v1 }
 0x4cd   :  { %1179 = vmatprep.subr.bf16.mxu0 %v1046_v62 }
 0x4ce   :  { %1180 = vmatpush1.bf16.msra.mxu0 %v1045_v61  ;;  %1221 = vmatpush1.bf16.msra.mxu1 %v1042_v30 }
 0x4cf   :  { %1222 = vmatprep.subr.bf16.mxu1 %v967_v43  ;;  %v977_v2 = vpop.permute.xlu1 %976  ;;  %v991_v8 = vpop.permute.xlu0 %990 }
 0x4d0   :  { %v1051_v5 = vsel %vm325_vm9, %v975_v0, %v977_v2  ;;  %v1057_v19 = vsel %vm325_vm9, %v989_v54, %v991_v8 }
 0x4d1   :  { %1181 = vmatprep.subr.bf16.mxu0 %v1051_v5 }
 0x4d2   :  { %1182 = vmatpush1.bf16.msra.mxu0 %v1050_v3  ;;  %1223 = vmatpush1.bf16.msra.mxu1 %v1047_v13 }
 0x4d3   :  { %v987_v9 = vpop.permute.xlu1 %986  ;;  %v1013_v16 = vpop.permute.xlu0 %1012 }
 0x4d4   :  { %v1055_v7 = vsel %vm325_vm9, %v2332_v21, %v987_v9  ;;  %v1056_v10 = vsel %vm325_vm9, %v987_v9, %v989_v54 }
 0x4d5   :  { %1183 = vmatprep.subr.bf16.mxu0 %v1056_v10 }
 0x4d6   :  { %1184 = vmatpush1.bf16.msra.mxu0 %v1055_v7 }
 0x4d7   :  { %v979_v12 = vpop.permute.xlu1 %978  ;;  %v1023_v21 = vpop.permute.xlu0 %1022 }
 0x4d8   :  { %v1052_v15 = vsel %vm325_vm9, %v977_v2, %v979_v12  ;;  %1224 = vmatprep.subr.bf16.mxu1 %v979_v12  ;;  %v1070_v57 = vsel %vm325_vm9, %v2356_v40, %v1023_v21 }
 0x4d9   :  { %1225 = vmatpush1.bf16.msra.mxu1 %v1052_v15 }
 0x4da   :  { %1226 = vmatprep.subr.bf16.mxu1 %v991_v8 }
 0x4db   :  { %v1001_v18 = vpop.permute.xlu1 %1000  ;;  %v1015_v29 = vpop.permute.xlu0 %1014 }
 0x4dc   :  { %v1061_v17 = vsel %vm325_vm9, %v999_v1, %v1001_v18  ;;  %v1067_v24 = vsel %vm325_vm9, %v1013_v16, %v1015_v29 }
 0x4dd   :  { %1185 = vmatprep.subr.bf16.mxu0 %v1061_v17  ;;  %1227 = vmatpush1.bf16.msra.mxu1 %v1057_v19 }
 0x4de   :  { %1186 = vmatpush1.bf16.msra.mxu0 %v1060_v23 }
 0x4df   :  { %v1011_v22 = vpop.permute.xlu1 %1010 }
 0x4e0   :  { %v1065_v32 = vsel %vm325_vm9, %v2337_v41, %v1011_v22  ;;  %v1066_v52 = vsel %vm325_vm9, %v1011_v22, %v1013_v16 }
 0x4e1   :  { %1187 = vmatprep.subr.bf16.mxu0 %v1066_v52 }
 0x4e2   :  { %1188 = vmatpush1.bf16.msra.mxu0 %v1065_v32 }
 0x4e3   :  { %v1003_v20 = vpop.permute.xlu1 %1002 }
 0x4e4   :  { %v1062_v14 = vsel %vm325_vm9, %v1001_v18, %v1003_v20  ;;  %1228 = vmatprep.subr.bf16.mxu1 %v1003_v20 }
 0x4e5   :  { %1229 = vmatpush1.bf16.msra.mxu1 %v1062_v14 }
 0x4e6   :  { %1230 = vmatprep.subr.bf16.mxu1 %v1015_v29 }
 0x4e7   :  { %v1025_v6 = vpop.permute.xlu1 %1024 }
 0x4e8   :  { %v1071_v45 = vsel %vm325_vm9, %v1023_v21, %v1025_v6 }
 0x4e9   :  { %1189 = vmatprep.subr.bf16.mxu0 %v1071_v45  ;;  %1231 = vmatpush1.bf16.msra.mxu1 %v1067_v24 }
 0x4ea   :  { %1190 = vmatpush1.bf16.msra.mxu0 %v1070_v57 }
 0x4eb   :  { %v1027_v41 = vpop.permute.xlu1 %1026 }
 0x4ec   :  { %v1072_v39 = vsel %vm325_vm9, %v1025_v6, %v1027_v41  ;;  %1232 = vmatprep.subr.bf16.mxu1 %v1027_v41 }
 0x4ed   :  { %1206 = vmatmul.mubr.bf16.vlgmr.msra.gmra.mrb[8].mxu0 %v2364_v42  ;;  %1233 = vmatpush1.bf16.msra.mxu1 %v1072_v39 }
 0x4f0   :  { %1249 = vmatmul.mubr.bf16.vlgmr.msra.gmra.mrb[8].mxu1 %v2364_v42 }
 0x598   :  { %v2410_v35 = vpop.f32.mrb[4].mxu1 }
 0x599   :  { %v1263_v37 = vmul.f32 %v2410_v35, %v1895_v26  ;;  %v2414_v59 = vpop.f32.mrb[5].mxu1 }
 0x59a   :  { %v1264_v56 = vmul.f32 %v2414_v59, %v1897_v27  ;;  %v2418_v63 = vpop.f32.mrb[6].mxu1 }
 0x59b   :  { %v1291_v31 = vmul.f32 %v1263_v37, %v2410_v35  ;;  %v1269_v36 = vmul.f32 %v2418_v63, %v1895_v26  ;;  %v2423_v60 = vpop.f32.mrb[7].mxu1 }
 0x59c   :  { %v1275_v38 = vadd.f32 %v1264_v56, %v1263_v37  ;;  %v1292_v25 = vmul.f32 %v1264_v56, %v2414_v59  ;;  %v1270_v0 = vmul.f32 %v2423_v60, %v1897_v27 }
 0x59d   :  { %v1297_v40 = vmul.f32 %v1269_v36, %v2418_v63 }
 0x59e   :  { %v1303_v44 = vadd.f32 %v1292_v25, %v1291_v31  ;;  %v1283_v28 = vadd.f32 %v1270_v0, %v1269_v36  ;;  %v1298_v42 = vmul.f32 %v1270_v0, %v2423_v60 }
 0x5a0   :  { %v1311_v43 = vadd.f32 %v1298_v42, %v1297_v40  ;;  %v1259_v42 = vld [vmem:[%s2578_s5] sm:$0xff] }
 0x5c0   :  { %v2430_v33 = vpop.f32.mrb[8].mxu0 }
 0x5c1   :  { %v1265_v26 = vmul.f32 %v2430_v33, %v1919_v4  ;;  %v2434_v34 = vpop.f32.mrb[9].mxu0 }
 0x5c2   :  { %v1266_v46 = vmul.f32 %v2434_v34, %v1921_v47  ;;  %v2438_v51 = vpop.f32.mrb[10].mxu0 }
 0x5c3   :  { %v1276_v27 = vadd.f32 %v1275_v38, %v1265_v26  ;;  %v1293_v54 = vmul.f32 %v1265_v26, %v2430_v33  ;;  %v1271_v53 = vmul.f32 %v2438_v51, %v1919_v4  ;;  %v2443_v48 = vpop.f32.mrb[11].mxu0  ;;  %v2445_v49 = vpop.f32.mrb[8].mxu1 }
 0x5c4   :  { %v1294_v58 = vmul.f32 %v1266_v46, %v2434_v34  ;;  %v1272_v11 = vmul.f32 %v2443_v48, %v1921_v47  ;;  %v1267_v61 = vmul.f32 %v2445_v49, %v1925_v50  ;;  %v2452_v62 = vpop.f32.mrb[9].mxu1 }
 0x5c5   :  { %v1304_v30 = vadd.f32 %v1303_v44, %v1293_v54  ;;  %v1277_v1 = vadd.f32 %v1276_v27, %v1266_v46  ;;  %v1284_v2 = vadd.f32 %v1283_v28, %v1271_v53  ;;  %v1299_v5 = vmul.f32 %v1271_v53, %v2438_v51  ;;  %v2455_v4 = vpop.f32.mrb[10].mxu1  ;;  %v1261_v46 = vld [vmem:[%s2579_s6] sm:$0xff]  ;;  %v1260_v27 = vld [vmem:[%s2578_s5 + $0x8] sm:$0xff] }
 0x5c6   :  { %v1300_v3 = vmul.f32 %v1272_v11, %v2443_v48  ;;  %v1295_v13 = vmul.f32 %v1267_v61, %v2445_v49  ;;  %v1268_v8 = vmul.f32 %v2452_v62, %v1935_v55  ;;  %v1273_v47 = vmul.f32 %v2455_v4, %v1925_v50  ;;  %v2463_v9 = vpop.f32.mrb[11].mxu1 }
 0x5c7   :  { %v1305_v7 = vadd.f32 %v1304_v30, %v1294_v58  ;;  %v1312_v10 = vadd.f32 %v1311_v43, %v1299_v5  ;;  %v1285_v12 = vadd.f32 %v1284_v2, %v1272_v11  ;;  %v1278_v15 = vadd.f32 %v1277_v1, %v1267_v61  ;;  %v1262_v61 = vld [vmem:[%s2579_s6 + $0x8] sm:$0xff] }
 0x5c8   :  { %v1296_v16 = vmul.f32 %v1268_v8, %v2452_v62  ;;  %v1301_v18 = vmul.f32 %v1273_v47, %v2455_v4  ;;  %v1274_v19 = vmul.f32 %v2463_v9, %v1935_v55  ;;  %v1279_v17 = vsel %vm609_vm10, %v1268_v8, 0.0 }
 0x5c9   :  { %v1313_v23 = vadd.f32 %v1312_v10, %v1300_v3  ;;  %v1306_v21 = vadd.f32 %v1305_v7, %v1295_v13  ;;  %v1286_v22 = vadd.f32 %v1285_v12, %v1273_v47  ;;  %v1280_v32 = vadd.f32 %v1279_v17, %v1278_v15 }
 0x5ca   :  { %v1287_v50 = vsel %vm609_vm10, %v1274_v19, 0.0  ;;  %v1302_v52 = vmul.f32 %v1274_v19, %v2463_v9  ;;  %v1307_v20 = vsel %vm609_vm10, %v1296_v16, 0.0 }
 0x5cb   :  { %v1314_v14 = vadd.f32 %v1313_v23, %v1301_v18  ;;  %1281 = vadd.xlane.f32.xlu0 %v1280_v32  ;;  %v1288_v29 = vadd.f32 %v1287_v50, %v1286_v22  ;;  %v1308_v6 = vadd.f32 %v1307_v20, %v1306_v21  ;;  %v1459_v22 = vld [vmem:[%s2572_s0 + $0x18] sm:$0xff]  ;;  %v1461_v50 = vld [vmem:[%s2572_s0 + $0x28] sm:$0xff]  ;;  %v1462_v20 = vld [vmem:[%s2572_s0 + $0x30] sm:$0xff] }
 0x5cc   :  { %v1315_v24 = vsel %vm609_vm10, %v1302_v52, 0.0 }
 0x5cd   :  { %1289 = vadd.xlane.f32.xlu1 %v1288_v29  ;;  %v1316_v55 = vadd.f32 %v1315_v24, %v1314_v14 }
 0x5cf   :  { %1309 = vadd.xlane.f32.xlu0 %v1308_v6 }
 0x5d3   :  { %1317 = vadd.xlane.f32.xlu0 %v1316_v55 }
 0x658   :  { %v1282_v45 = vpop.xlane.xlu0 %1281 }
 0x659   :  { %v1319_v57 = vmul.f32 0.001953125, %v1282_v45 }
 0x65a   :  { %v1290_v41 = vpop.xlane.xlu1 %1289 }
 0x65b   :  { %v1323_v37 = vmul.f32 %v1319_v57, %v1319_v57  ;;  %v1320_v56 = vmul.f32 0.001953125, %v1290_v41 }
 0x65c   :  { %v1310_v39 = vpop.xlane.xlu0 %1309 }
 0x65d   :  { %v1321_v31 = vmul.f32 0.001953125, %v1310_v39  ;;  %v1324_v25 = vmul.f32 %v1320_v56, %v1320_v56 }
 0x65f   :  { %v1325_v36 = vsub.f32 %v1321_v31, %v1323_v37 }
 0x660   :  { %v1318_v38 = vpop.xlane.xlu0 %1317 }
 0x661   :  { %v1327_v0 = vadd.f32 1e-05, %v1325_v36  ;;  %v1322_v40 = vmul.f32 0.001953125, %v1318_v38  ;;  %v1463_v38 = vld [vmem:[%s2572_s0 + $0x48] sm:$0xff] }
 0x663   :  { %1453 = vrsqrt.f32 %v1327_v0  ;;  %v1326_v44 = vsub.f32 %v1322_v40, %v1324_v25  ;;  %v1464_v0 = vld [vmem:[%s2572_s0 + $0x50] sm:$0xff] }
 0x665   :  { %v1328_v28 = vadd.f32 1e-05, %v1326_v44  ;;  %v1465_v44 = vld [vmem:[%s2572_s0 + $0x58] sm:$0xff] }
 0x667   :  { %1455 = vrsqrt.f32 %v1328_v28 }
 0x66d   :  { %v1454_v43 = vpop.eup %1453 }
 0x66e   :  { %v1331_v26 = vmul.f32 %v1454_v43, %v1259_v42  ;;  %v1466_v42 = vld [vmem:[%s2572_s0 + $0x60] sm:$0xff] }
 0x670   :  { %1339 = vperm.xlu1 %1442, %v1331_v26   ;;  %v1333_v54 = vmul.f32 %v1331_v26, %v1319_v57  ;;  %v1467_v26 = vld [vmem:[%s2572_s0 + $0x68] sm:$0xff] }
 0x671   :  { %v1456_v53 = vpop.eup %1455 }
 0x672   :  { %v1335_v58 = vsub.f32 %v1261_v46, %v1333_v54  ;;  %v1332_v11 = vmul.f32 %v1456_v53, %v1260_v27  ;;  %v1468_v27 = vld [vmem:[%s2572_s0 + $0x70] sm:$0xff] }
 0x674   :  { %1361 = vperm.xlu1 %1442, %v1335_v58   ;;  %1344 = vperm.xlu0 %1441, %v1332_v11   ;;  %v1334_v30 = vmul.f32 %v1332_v11, %v1320_v56 }
 0x676   :  { %v1336_v1 = vsub.f32 %v1262_v61, %v1334_v30 }
 0x678   :  { %1366 = vperm.xlu1 %1442, %v1336_v1  }
 0x6ef   :  { %v1340_v2 = vpop.permute.xlu1 %1339 }
 0x6f0   :  { %v1347_v5 = vmul.f32 %v1340_v2, %v2410_v35  ;;  %v1348_v3 = vmul.f32 %v1340_v2, %v2414_v59  ;;  %v1349_v13 = vmul.f32 %v1340_v2, %v2430_v33  ;;  %v1350_v8 = vmul.f32 %v1340_v2, %v2434_v34 }
 0x6f1   :  { %v1351_v10 = vmul.f32 %v1340_v2, %v2445_v49  ;;  %v1352_v12 = vmul.f32 %v1340_v2, %v2452_v62 }
 0x6f3   :  { %v1345_v47 = vpop.permute.xlu0 %1344  ;;  %v1362_v7 = vpop.permute.xlu1 %1361 }
 0x6f4   :  { %v1353_v15 = vmul.f32 %v1345_v47, %v2418_v63  ;;  %v1354_v16 = vmul.f32 %v1345_v47, %v2423_v60  ;;  %v1355_v18 = vmul.f32 %v1345_v47, %v2438_v51  ;;  %v1356_v35 = vmul.f32 %v1345_v47, %v2443_v48  ;;  %v1457_v63 = vld [vmem:[%s2572_s0 + $0x8] sm:$0xff]  ;;  %v1458_v60 = vld [vmem:[%s2572_s0 + $0x10] sm:$0xff] }
 0x6f5   :  { %v1369_v19 = vadd.f32 %v1362_v7, %v1347_v5  ;;  %v1370_v59 = vadd.f32 %v1362_v7, %v1348_v3  ;;  %v1371_v17 = vadd.f32 %v1362_v7, %v1349_v13  ;;  %v1372_v33 = vadd.f32 %v1362_v7, %v1350_v8 }
 0x6f6   :  { %v1373_v23 = vadd.f32 %v1362_v7, %v1351_v10  ;;  %v1374_v34 = vadd.f32 %v1362_v7, %v1352_v12  ;;  %v1357_v21 = vmul.f32 %v1345_v47, %v2455_v4  ;;  %v1358_v49 = vmul.f32 %v1345_v47, %v2463_v9  ;;  %v1460_v4 = vld [vmem:[%s2572_s0 + $0x20] sm:$0xff] }
 0x6f7   :  { %v1381_v62 = vadd.f32 %v1457_v63, %v1369_v19  ;;  %v1382_v51 = vadd.f32 %v1458_v60, %v1370_v59  ;;  %v1367_v48 = vpop.permute.xlu1 %1366  ;;  %v1383_v32 = vadd.f32 %v1459_v22, %v1371_v17  ;;  %v1384_v9 = vadd.f32 %v1460_v4, %v1372_v33 }
 0x6f8   :  { %v1385_v52 = vadd.f32 %v1461_v50, %v1373_v23  ;;  %v1386_v14 = vadd.f32 %v1462_v20, %v1374_v34  ;;  %v1375_v24 = vadd.f32 %v1367_v48, %v1353_v15  ;;  %v1376_v55 = vadd.f32 %v1367_v48, %v1354_v16 }
 0x6f9   :  { %v1393_v29 = vmax.f32 %v1381_v62, 0.0  ;;  %v1394_v6 = vmax.f32 %v1382_v51, 0.0  ;;  %v1395_v45 = vmax.f32 %v1383_v32, 0.0  ;;  %v1396_v57 = vmax.f32 %v1384_v9, 0.0 }
 0x6fa   :  { %v1397_v41 = vmax.f32 %v1385_v52, 0.0  ;;  %v1398_v39 = vmax.f32 %v1386_v14, 0.0  ;;  %v1377_v37 = vadd.f32 %v1367_v48, %v1355_v18  ;;  %v1378_v56 = vadd.f32 %v1367_v48, %v1356_v35 }
 0x6fb   :  { %1405 = vst [vmem:[%s2580_s8] sm:$0xff] %v1393_v29  ;;  %1406 = vst [vmem:[%s2580_s8 + $0x8] sm:$0xff] %v1394_v6  ;;  %v1379_v31 = vadd.f32 %v1367_v48, %v1357_v21  ;;  %v1380_v36 = vadd.f32 %v1367_v48, %v1358_v49  ;;  %v1387_v25 = vadd.f32 %v1463_v38, %v1375_v24 }
 0x6fc   :  { %1407 = vst [vmem:[%s2580_s8 + $0x10] sm:$0xff] %v1395_v45  ;;  %1408 = vst [vmem:[%s2580_s8 + $0x18] sm:$0xff] %v1396_v57  ;;  %v1388_v40 = vadd.f32 %v1464_v0, %v1376_v55  ;;  %v1389_v28 = vadd.f32 %v1465_v44, %v1377_v37  ;;  %v1390_v43 = vadd.f32 %v1466_v42, %v1378_v56 }
 0x6fd   :  { %1409 = vst [vmem:[%s2580_s8 + $0x20] sm:$0xff] %v1397_v41  ;;  %1410 = vst.msk [vmem:[%s2580_s8 + $0x28] sm:$0xff] %vm609_vm10, %v1398_v39  ;;  %v1391_v46 = vadd.f32 %v1467_v26, %v1379_v31  ;;  %v1392_v54 = vadd.f32 %v1468_v27, %v1380_v36  ;;  %v1399_v53 = vmax.f32 %v1387_v25, 0.0 }
 0x6fe   :  { %v1400_v58 = vmax.f32 %v1388_v40, 0.0  ;;  %v1401_v11 = vmax.f32 %v1389_v28, 0.0  ;;  %v1402_v61 = vmax.f32 %v1390_v43, 0.0 }
 0x6ff   :  { %v1403_v30 = vmax.f32 %v1391_v46, 0.0  ;;  %v1404_v1 = vmax.f32 %v1392_v54, 0.0  ;;  %1411 = vst [vmem:[%s2580_s8 + $0x30] sm:$0xff] %v1399_v53 }
 0x700   :  { %1412 = vst [vmem:[%s2580_s8 + $0x38] sm:$0xff] %v1400_v58  ;;  %1413 = vst [vmem:[%s2580_s8 + $0x40] sm:$0xff] %v1401_v11 }
 0x701   :  { %1414 = vst [vmem:[%s2580_s8 + $0x48] sm:$0xff] %v1402_v61  ;;  %1415 = vst [vmem:[%s2580_s8 + $0x50] sm:$0xff] %v1403_v30 }
 0x702   :  { %1416 = vst.msk [vmem:[%s2580_s8 + $0x58] sm:$0xff] %vm609_vm10, %v1404_v1 }

</bundles_post_ra>
